<compile_context>
chip_gen: v7x
topology: tpu7x:2x2x1
jax: 0.10.0
libtpu: 0.0.40
codegen_flags: <defaults>
</compile_context>

<pallas_src>
import jax
import jax.numpy as jnp
from jax import lax
from jax.experimental import pallas as pl
from jax.experimental.pallas import tpu as pltpu


def _round_up(x, m):
    return ((x + m - 1) // m) * m


def _pick_b_tile(batch):
    """Rows per block: fill sublanes when batch is large, but keep >= 2 grid steps when
    possible so the 'parallel' batch axis can be split across v7x's two TensorCores."""
    for cand in (8, 4, 2):
        if batch % cand == 0 and batch // cand >= 2:
            return cand
    return 1


# ----------------------------------------------------------------------------
# Fused multi-level attention kernel (b_tile batch rows per grid step)
# ----------------------------------------------------------------------------
def _make_fused_kernel(lengths, l_pad, b_tile):
    depth = len(lengths)

    def kernel(params_ref, feat_ref, out_ref):
        # params_ref: SMEM (depth*8,)            [wq,bq,wk,bk,wv,bv,wo,bo] per level
        # feat_ref  : VMEM (b_tile, depth, l_pad) zero-padded features for b_tile rows
        # out_ref   : VMEM (b_tile, 1, l_pad)     x[depth-1], accumulated in place
        out_ref[...] = jnp.zeros_like(out_ref)

        for lvl in range(depth):                       # static unroll over pyramid levels
            L = lengths[lvl]                           # static Python int
            lq = _round_up(L, 8)                       # query rows  (sublane axis)
            lk = _round_up(L, 128)                     # key lanes   (lane axis)
            base = lvl * 8
            wq = params_ref[base + 0]
            bq = params_ref[base + 1]
            wk = params_ref[base + 2]
            bk = params_ref[base + 3]
            wv = params_ref[base + 4]
            bv = params_ref[base + 5]
            wo = params_ref[base + 6]
            bo = params_ref[base + 7]

            f = feat_ref[:, lvl, :lk]                  # (b_tile, lk)  static slice
            k = f * wk + bk
            v = f * wv + bv
            q = f[:, :lq] * wq + bq                    # (b_tile, lq)

            lane_k = lax.broadcasted_iota(jnp.int32, (1, lk), 1)
            key_valid = lane_k < L                     # (1, lk)

            # Closed-form row max of the rank-1 score (exact): O(L) instead of O(L^2) XLU.
            kmax = jnp.max(jnp.where(key_valid, k, -1e30), axis=-1, keepdims=True)
            kmin = jnp.min(jnp.where(key_valid, k, 1e30), axis=-1, keepdims=True)
            m = jnp.where(q >= 0.0, q * kmax, q * kmin)              # (b_tile, lq)

            # Scores: queries on sublanes, keys on lanes; padded keys -> exp(-1e30) = 0.
            s = q[:, :, None] * k[:, None, :] - m[:, :, None]        # (b_tile, lq, lk)
            s = jnp.where(key_valid[:, None, :], s, -1e30)
            p = jnp.exp(s)

            # [num | den | 0...] = p @ W on the otherwise-idle MXU.
            # W: (b_tile, lk, 128) with v in lane 0 and ones in lane 1.
            col = lax.broadcasted_iota(jnp.int32, (1, 1, 128), 2)
            ones_col = (col == 1).astype(jnp.float32)                # (1, 1, 128)
            w_mat = jnp.where(col == 0, v[:, :, None], ones_col)     # (b_tile, lk, 128)
            nd = jnp.einsum("bqk,bkn->bqn", p, w_mat,
                            preferred_element_type=jnp.float32,
                            precision=lax.Precision.HIGHEST)         # (b_tile, lq, 128)
            num = nd[:, :, 0]                                        # (b_tile, lq)
            den = nd[:, :, 1]                                        # >= 1 (row max -> exp(0)=1)

            # Deferred softmax normalization + scalar output projection.
            # approx=False kept for exact parity with the reference softmax at 1e-5 atol.
            y = num * pl.reciprocal(den, approx=False) * wo + bo     # (b_tile, lq)

            # Zero padded query rows so the zero-pad residual x[i-1] -> x[i] is exact,
            # then accumulate into the carried output at static offset 0.
            lane_q = lax.broadcasted_iota(jnp.int32, (1, lq), 1)
            y = jnp.where(lane_q < L, y, 0.0)
            out_ref[:, 0, :lq] += y

    return kernel


def fused_processing_call(params_arr, stacked_feats, lengths, l_pad):
    """params_arr: (depth*8,) f32; stacked_feats: (B, depth, l_pad) f32 -> (B, 1, l_pad) f32."""
    batch, depth, _ = stacked_feats.shape
    b_tile = _pick_b_tile(batch)
    kernel = _make_fused_kernel(tuple(lengths), l_pad, b_tile)
    return pl.pallas_call(
        kernel,
        out_shape=jax.ShapeDtypeStruct((batch, 1, l_pad), jnp.float32),
        grid=(batch // b_tile,),
        in_specs=[
            pl.BlockSpec(memory_space=pltpu.MemorySpace.SMEM),            # flat params
            pl.BlockSpec((b_tile, depth, l_pad), lambda b: (b, 0, 0)),    # b_tile rows
        ],
        out_specs=pl.BlockSpec((b_tile, 1, l_pad), lambda b: (b, 0, 0)),
        compiler_params=pltpu.CompilerParams(
            dimension_semantics=("parallel",),                            # v7x: 2 TCs
        ),
    )(params_arr, stacked_feats)


# ----------------------------------------------------------------------------
# Glue: signal -> feature pyramid (the module's `signal_to_feature_func`)
# ----------------------------------------------------------------------------
def signal_to_features(signal):
    """signal (B, L) -> list of (B, L_i, 1) features with non-decreasing lengths."""
    return [
        signal[:, ::4, None],   # (B, L/4, 1)
        signal[:, ::2, None],   # (B, L/2, 1)
        signal[:, :, None],     # (B, L,   1)
    ]


def init_attention_params(key, depth):
    """Deterministic scalar attention params per level: [wq,bq,wk,bk,wv,bv,wo,bo]."""
    keys = jax.random.split(key, depth)
    return [0.5 * jax.random.normal(k, (8,), dtype=jnp.float32) for k in keys]


def processing_layer_forward(signal, params_per_level):
    """Full ProcessingLayer forward. Returns x[depth-1] with shape (B, L_last, 1)."""
    feats = signal_to_features(signal)
    batch = feats[0].shape[0]
    lengths = tuple(int(f.shape[1]) for f in feats)
    l_last = lengths[-1]
    l_pad = _round_up(l_last, 128)                       # lane-dense output length

    # One stack of zero-padded levels (single HBM materialization): (B, depth, l_pad)
    stacked = jnp.stack(
        [jnp.pad(f[..., 0].astype(jnp.float32), ((0, 0), (0, l_pad - li)))
         for f, li in zip(feats, lengths)],
        axis=1,
    )
    # Flat 1-D SMEM param table: (depth*8,)
    params_arr = jnp.concatenate(
        [p.astype(jnp.float32).reshape(-1) for p in params_per_level]
    )

    out = fused_processing_call(params_arr, stacked, lengths, l_pad)  # (B, 1, l_pad)
    return out[:, 0, :l_last, None]                                   # (B, L_last, 1)


# ----------------------------------------------------------------------------
# Pure-JAX reference (mirrors the PyTorch forward) for a correctness check
# ----------------------------------------------------------------------------
def reference_forward(signal, params_per_level):
    feats = signal_to_features(signal)
    x = None
    for i, f in enumerate(feats):
        wq, bq, wk, bk, wv, bv, wo, bo = [params_per_level[i][j] for j in range(8)]
        fv = f[..., 0].astype(jnp.float32)                 # (B, L_i)
        q = fv * wq + bq
        k = fv * wk + bk
        v = fv * wv + bv
        s = q[:, :, None] * k[:, None, :]                  # (B, L, L)
        attn = jax.nn.softmax(s, axis=-1)
        y = jnp.sum(attn * v[:, None, :], axis=-1) * wo + bo
        if x is None:
            x = y
        else:
            pad = y.shape[1] - x.shape[1]
            x = y + jnp.pad(x, ((0, 0), (0, pad)))
    return x[..., None]


if __name__ == "__main__":
    B, L = 2, 16
    key = jax.random.PRNGKey(0)
    k_sig, k_par = jax.random.split(key)
    signal = jax.random.normal(k_sig, (B, L), dtype=jnp.float32)

    depth = len(signal_to_features(signal))                # = 3
    params = init_attention_params(k_par, depth)

    out = processing_layer_forward(signal, params)
    out = jax.block_until_ready(out)
    assert out.shape == (B, L, 1), out.shape

    ref = reference_forward(signal, params)
    assert jnp.allclose(out, ref, atol=1e-5, rtol=1e-4), float(jnp.max(jnp.abs(out - ref)))

    print("KERNEL_OK")
</pallas_src>

<mosaic_0001>
module attributes {stable_mosaic.version = 11 : i64} {
  func.func @kernel(%arg0: i32, %arg1: memref<24xf32, #tpu.memory_space<smem>>, %arg2: memref<1x3x128xf32, #tpu.memory_space<vmem>>, %arg3: memref<1x1x128xf32, #tpu.memory_space<vmem>>) attributes {dimension_semantics = [#tpu.dimension_semantics<parallel>], iteration_bounds = array<i64: 2>, scalar_prefetch = 0 : i64, scratch_operands = 0 : i64, tpu.core_type = #tpu.core_type<tc>, window_params = [{transform_indices = @transform_0, window_bounds = array<i64: 24>}, {transform_indices = @transform_1, window_bounds = array<i64: 1, 3, 128>}, {transform_indices = @transform_2, window_bounds = array<i64: 1, 1, 128>}]} {
    %cst = arith.constant 0.000000e+00 : f32
    %0 = vector.broadcast %cst : f32 to vector<1x1x128xf32>
    %c0 = arith.constant 0 : index
    %c0_0 = arith.constant 0 : index
    %c0_1 = arith.constant 0 : index
    %1 = vector.load %arg3[%c0, %c0_0, %c0_1] : memref<1x1x128xf32, #tpu.memory_space<vmem>>, vector<1x1x128xf32>
    tpu.vector_store %arg3[%c0, %c0_0, %c0_1], %0 {strides = array<i32>} : memref<1x1x128xf32, #tpu.memory_space<vmem>>, vector<1x1x128xf32>,
    %c0_2 = arith.constant 0 : index
    %2 = memref.load %arg1[%c0_2] : memref<24xf32, #tpu.memory_space<smem>>
    %c1 = arith.constant 1 : index
    %3 = memref.load %arg1[%c1] : memref<24xf32, #tpu.memory_space<smem>>
    %c2 = arith.constant 2 : index
    %4 = memref.load %arg1[%c2] : memref<24xf32, #tpu.memory_space<smem>>
    %c3 = arith.constant 3 : index
    %5 = memref.load %arg1[%c3] : memref<24xf32, #tpu.memory_space<smem>>
    %c4 = arith.constant 4 : index
    %6 = memref.load %arg1[%c4] : memref<24xf32, #tpu.memory_space<smem>>
    %c5 = arith.constant 5 : index
    %7 = memref.load %arg1[%c5] : memref<24xf32, #tpu.memory_space<smem>>
    %c6 = arith.constant 6 : index
    %8 = memref.load %arg1[%c6] : memref<24xf32, #tpu.memory_space<smem>>
    %c7 = arith.constant 7 : index
    %9 = memref.load %arg1[%c7] : memref<24xf32, #tpu.memory_space<smem>>
    %c0_3 = arith.constant 0 : index
    %c0_4 = arith.constant 0 : index
    %c0_5 = arith.constant 0 : index
    %10 = vector.load %arg2[%c0_3, %c0_4, %c0_5] : memref<1x3x128xf32, #tpu.memory_space<vmem>>, vector<1x1x128xf32>
    %11 = vector.shape_cast %10 : vector<1x1x128xf32> to vector<1x128xf32>
    %12 = vector.broadcast %4 : f32 to vector<1x128xf32>
    %13 = arith.mulf %11, %12 : vector<1x128xf32>
    %14 = vector.broadcast %5 : f32 to vector<1x128xf32>
    %15 = arith.addf %13, %14 : vector<1x128xf32>
    %16 = vector.broadcast %6 : f32 to vector<1x128xf32>
    %17 = arith.mulf %11, %16 : vector<1x128xf32>
    %18 = vector.broadcast %7 : f32 to vector<1x128xf32>
    %19 = arith.addf %17, %18 : vector<1x128xf32>
    %20 = vector.extract_strided_slice %11 {offsets = [0, 0], sizes = [1, 8], strides = [1, 1]} : vector<1x128xf32> to vector<1x8xf32>
    %21 = vector.broadcast %2 : f32 to vector<1x8xf32>
    %22 = arith.mulf %20, %21 : vector<1x8xf32>
    %23 = vector.broadcast %3 : f32 to vector<1x8xf32>
    %24 = arith.addf %22, %23 : vector<1x8xf32>
    %25 = tpu.iota {dimensions = array<i32: 1>} : vector<1x128xi32>
    %c4_i32 = arith.constant 4 : i32
    %26 = vector.broadcast %c4_i32 : i32 to vector<1x128xi32>
    %27 = arith.cmpi slt, %25, %26 : vector<1x128xi32>
    %cst_6 = arith.constant -1.000000e+30 : f32
    %28 = vector.broadcast %cst_6 : f32 to vector<1x128xf32>
    %29 = arith.select %27, %15, %28 : vector<1x128xi1>, vector<1x128xf32>
    %cst_7 = arith.constant dense<0xFF800000> : vector<1xf32>
    %30 = vector.multi_reduction <maximumf>, %29, %cst_7 [1] : vector<1x128xf32> to vector<1xf32>
    %31 = vector.shape_cast %30 : vector<1xf32> to vector<1x1xf32>
    %cst_8 = arith.constant 1.000000e+30 : f32
    %32 = vector.broadcast %cst_8 : f32 to vector<1x128xf32>
    %33 = arith.select %27, %15, %32 : vector<1x128xi1>, vector<1x128xf32>
    %cst_9 = arith.constant dense<0x7F800000> : vector<1xf32>
    %34 = vector.multi_reduction <minimumf>, %33, %cst_9 [1] : vector<1x128xf32> to vector<1xf32>
    %35 = vector.shape_cast %34 : vector<1xf32> to vector<1x1xf32>
    %cst_10 = arith.constant 0.000000e+00 : f32
    %36 = vector.broadcast %cst_10 : f32 to vector<1x8xf32>
    %37 = arith.cmpf oge, %24, %36 : vector<1x8xf32>
    %38 = vector.broadcast %31 : vector<1x1xf32> to vector<1x8xf32>
    %39 = arith.mulf %24, %38 : vector<1x8xf32>
    %40 = vector.broadcast %35 : vector<1x1xf32> to vector<1x8xf32>
    %41 = arith.mulf %24, %40 : vector<1x8xf32>
    %42 = arith.select %37, %39, %41 : vector<1x8xi1>, vector<1x8xf32>
    %43 = vector.shape_cast %24 : vector<1x8xf32> to vector<1x8x1xf32>
    %44 = vector.shape_cast %15 : vector<1x128xf32> to vector<1x1x128xf32>
    %45 = vector.broadcast %43 : vector<1x8x1xf32> to vector<1x8x128xf32>
    %46 = vector.broadcast %44 : vector<1x1x128xf32> to vector<1x8x128xf32>
    %47 = arith.mulf %45, %46 : vector<1x8x128xf32>
    %48 = vector.shape_cast %42 : vector<1x8xf32> to vector<1x8x1xf32>
    %49 = vector.broadcast %48 : vector<1x8x1xf32> to vector<1x8x128xf32>
    %50 = arith.subf %47, %49 : vector<1x8x128xf32>
    %51 = vector.shape_cast %27 : vector<1x128xi1> to vector<1x1x128xi1>
    %cst_11 = arith.constant -1.000000e+30 : f32
    %52 = vector.shape_cast %51 : vector<1x1x128xi1> to vector<1x1x128xi1>
    %53 = vector.broadcast %52 : vector<1x1x128xi1> to vector<1x8x128xi1>
    %54 = vector.broadcast %cst_11 : f32 to vector<1x8x128xf32>
    %55 = arith.select %53, %50, %54 : vector<1x8x128xi1>, vector<1x8x128xf32>
    %56 = math.exp %55 : vector<1x8x128xf32>
    %57 = tpu.iota {dimensions = array<i32: 2>} : vector<1x1x128xi32>
    %c1_i32 = arith.constant 1 : i32
    %58 = vector.broadcast %c1_i32 : i32 to vector<1x1x128xi32>
    %59 = arith.cmpi eq, %57, %58 : vector<1x1x128xi32>
    %60 = arith.extui %59 : vector<1x1x128xi1> to vector<1x1x128xi32>
    %61 = arith.sitofp %60 : vector<1x1x128xi32> to vector<1x1x128xf32>
    %c0_i32 = arith.constant 0 : i32
    %62 = vector.broadcast %c0_i32 : i32 to vector<1x1x128xi32>
    %63 = arith.cmpi eq, %57, %62 : vector<1x1x128xi32>
    %64 = vector.shape_cast %19 : vector<1x128xf32> to vector<1x128x1xf32>
    %65 = vector.shape_cast %63 : vector<1x1x128xi1> to vector<1x1x128xi1>
    %66 = vector.broadcast %65 : vector<1x1x128xi1> to vector<1x128x128xi1>
    %67 = vector.shape_cast %64 : vector<1x128x1xf32> to vector<1x128x1xf32>
    %68 = vector.broadcast %67 : vector<1x128x1xf32> to vector<1x128x128xf32>
    %69 = vector.shape_cast %61 : vector<1x1x128xf32> to vector<1x1x128xf32>
    %70 = vector.broadcast %69 : vector<1x1x128xf32> to vector<1x128x128xf32>
    %71 = arith.select %66, %68, %70 : vector<1x128x128xi1>, vector<1x128x128xf32>
    "tpu.trace_start"() <{level = 10 : i32, message = "bqk,bkn->bqn"}> : () -> ()
    %cst_12 = arith.constant dense<0.000000e+00> : vector<1x8x128xf32>
    %72 = tpu.matmul %56, %71, %cst_12 {dimension_numbers = #tpu.dot_dimension_numbers<[2], [1], [1], [2], [0, 0, 0, 1, 1, 2], [0], [0]>, precision = #tpu.contract_precision<fp32>} : vector<1x8x128xf32>, vector<1x128x128xf32>, vector<1x8x128xf32> -> vector<1x8x128xf32>
    "tpu.trace_stop"() : () -> ()
    %73 = vector.extract_strided_slice %72 {offsets = [0, 0, 0], sizes = [1, 8, 1], strides = [1, 1, 1]} : vector<1x8x128xf32> to vector<1x8x1xf32>
    %74 = vector.shape_cast %73 : vector<1x8x1xf32> to vector<1x8xf32>
    %75 = vector.extract_strided_slice %72 {offsets = [0, 0, 1], sizes = [1, 8, 1], strides = [1, 1, 1]} : vector<1x8x128xf32> to vector<1x8x1xf32>
    %76 = vector.shape_cast %75 : vector<1x8x1xf32> to vector<1x8xf32>
    %77 = tpu.reciprocal %76 : vector<1x8xf32> -> vector<1x8xf32>
    %78 = arith.mulf %74, %77 : vector<1x8xf32>
    %79 = vector.broadcast %8 : f32 to vector<1x8xf32>
    %80 = arith.mulf %78, %79 : vector<1x8xf32>
    %81 = vector.broadcast %9 : f32 to vector<1x8xf32>
    %82 = arith.addf %80, %81 : vector<1x8xf32>
    %83 = tpu.iota {dimensions = array<i32: 1>} : vector<1x8xi32>
    %c4_i32_13 = arith.constant 4 : i32
    %84 = vector.broadcast %c4_i32_13 : i32 to vector<1x8xi32>
    %85 = arith.cmpi slt, %83, %84 : vector<1x8xi32>
    %cst_14 = arith.constant 0.000000e+00 : f32
    %86 = vector.broadcast %cst_14 : f32 to vector<1x8xf32>
    %87 = arith.select %85, %82, %86 : vector<1x8xi1>, vector<1x8xf32>
    %c0_15 = arith.constant 0 : index
    %c0_16 = arith.constant 0 : index
    %c0_17 = arith.constant 0 : index
    %88 = vector.load %arg3[%c0_15, %c0_16, %c0_17] : memref<1x1x128xf32, #tpu.memory_space<vmem>>, vector<1x1x8xf32>
    %89 = vector.shape_cast %88 : vector<1x1x8xf32> to vector<1x8xf32>
    %90 = arith.addf %89, %87 : vector<1x8xf32>
    %c0_18 = arith.constant 0 : index
    %c0_19 = arith.constant 0 : index
    %c0_20 = arith.constant 0 : index
    %91 = vector.load %arg3[%c0_18, %c0_19, %c0_20] : memref<1x1x128xf32, #tpu.memory_space<vmem>>, vector<1x1x8xf32>
    %92 = vector.shape_cast %91 : vector<1x1x8xf32> to vector<1x8xf32>
    %93 = vector.shape_cast %90 : vector<1x8xf32> to vector<1x1x8xf32>
    tpu.vector_store %arg3[%c0_18, %c0_19, %c0_20], %93 {strides = array<i32>} : memref<1x1x128xf32, #tpu.memory_space<vmem>>, vector<1x1x8xf32>,
    %c8 = arith.constant 8 : index
    %94 = memref.load %arg1[%c8] : memref<24xf32, #tpu.memory_space<smem>>
    %c9 = arith.constant 9 : index
    %95 = memref.load %arg1[%c9] : memref<24xf32, #tpu.memory_space<smem>>
    %c10 = arith.constant 10 : index
    %96 = memref.load %arg1[%c10] : memref<24xf32, #tpu.memory_space<smem>>
    %c11 = arith.constant 11 : index
    %97 = memref.load %arg1[%c11] : memref<24xf32, #tpu.memory_space<smem>>
    %c12 = arith.constant 12 : index
    %98 = memref.load %arg1[%c12] : memref<24xf32, #tpu.memory_space<smem>>
    %c13 = arith.constant 13 : index
    %99 = memref.load %arg1[%c13] : memref<24xf32, #tpu.memory_space<smem>>
    %c14 = arith.constant 14 : index
    %100 = memref.load %arg1[%c14] : memref<24xf32, #tpu.memory_space<smem>>
    %c15 = arith.constant 15 : index
    %101 = memref.load %arg1[%c15] : memref<24xf32, #tpu.memory_space<smem>>
    %c0_21 = arith.constant 0 : index
    %c1_22 = arith.constant 1 : index
    %c0_23 = arith.constant 0 : index
    %102 = vector.load %arg2[%c0_21, %c1_22, %c0_23] : memref<1x3x128xf32, #tpu.memory_space<vmem>>, vector<1x1x128xf32>
    %103 = vector.shape_cast %102 : vector<1x1x128xf32> to vector<1x128xf32>
    %104 = vector.broadcast %96 : f32 to vector<1x128xf32>
    %105 = arith.mulf %103, %104 : vector<1x128xf32>
    %106 = vector.broadcast %97 : f32 to vector<1x128xf32>
    %107 = arith.addf %105, %106 : vector<1x128xf32>
    %108 = vector.broadcast %98 : f32 to vector<1x128xf32>
    %109 = arith.mulf %103, %108 : vector<1x128xf32>
    %110 = vector.broadcast %99 : f32 to vector<1x128xf32>
    %111 = arith.addf %109, %110 : vector<1x128xf32>
    %112 = vector.extract_strided_slice %103 {offsets = [0, 0], sizes = [1, 8], strides = [1, 1]} : vector<1x128xf32> to vector<1x8xf32>
    %113 = vector.broadcast %94 : f32 to vector<1x8xf32>
    %114 = arith.mulf %112, %113 : vector<1x8xf32>
    %115 = vector.broadcast %95 : f32 to vector<1x8xf32>
    %116 = arith.addf %114, %115 : vector<1x8xf32>
    %117 = tpu.iota {dimensions = array<i32: 1>} : vector<1x128xi32>
    %c8_i32 = arith.constant 8 : i32
    %118 = vector.broadcast %c8_i32 : i32 to vector<1x128xi32>
    %119 = arith.cmpi slt, %117, %118 : vector<1x128xi32>
    %cst_24 = arith.constant -1.000000e+30 : f32
    %120 = vector.broadcast %cst_24 : f32 to vector<1x128xf32>
    %121 = arith.select %119, %107, %120 : vector<1x128xi1>, vector<1x128xf32>
    %cst_25 = arith.constant dense<0xFF800000> : vector<1xf32>
    %122 = vector.multi_reduction <maximumf>, %121, %cst_25 [1] : vector<1x128xf32> to vector<1xf32>
    %123 = vector.shape_cast %122 : vector<1xf32> to vector<1x1xf32>
    %cst_26 = arith.constant 1.000000e+30 : f32
    %124 = vector.broadcast %cst_26 : f32 to vector<1x128xf32>
    %125 = arith.select %119, %107, %124 : vector<1x128xi1>, vector<1x128xf32>
    %cst_27 = arith.constant dense<0x7F800000> : vector<1xf32>
    %126 = vector.multi_reduction <minimumf>, %125, %cst_27 [1] : vector<1x128xf32> to vector<1xf32>
    %127 = vector.shape_cast %126 : vector<1xf32> to vector<1x1xf32>
    %cst_28 = arith.constant 0.000000e+00 : f32
    %128 = vector.broadcast %cst_28 : f32 to vector<1x8xf32>
    %129 = arith.cmpf oge, %116, %128 : vector<1x8xf32>
    %130 = vector.broadcast %123 : vector<1x1xf32> to vector<1x8xf32>
    %131 = arith.mulf %116, %130 : vector<1x8xf32>
    %132 = vector.broadcast %127 : vector<1x1xf32> to vector<1x8xf32>
    %133 = arith.mulf %116, %132 : vector<1x8xf32>
    %134 = arith.select %129, %131, %133 : vector<1x8xi1>, vector<1x8xf32>
    %135 = vector.shape_cast %116 : vector<1x8xf32> to vector<1x8x1xf32>
    %136 = vector.shape_cast %107 : vector<1x128xf32> to vector<1x1x128xf32>
    %137 = vector.broadcast %135 : vector<1x8x1xf32> to vector<1x8x128xf32>
    %138 = vector.broadcast %136 : vector<1x1x128xf32> to vector<1x8x128xf32>
    %139 = arith.mulf %137, %138 : vector<1x8x128xf32>
    %140 = vector.shape_cast %134 : vector<1x8xf32> to vector<1x8x1xf32>
    %141 = vector.broadcast %140 : vector<1x8x1xf32> to vector<1x8x128xf32>
    %142 = arith.subf %139, %141 : vector<1x8x128xf32>
    %143 = vector.shape_cast %119 : vector<1x128xi1> to vector<1x1x128xi1>
    %cst_29 = arith.constant -1.000000e+30 : f32
    %144 = vector.shape_cast %143 : vector<1x1x128xi1> to vector<1x1x128xi1>
    %145 = vector.broadcast %144 : vector<1x1x128xi1> to vector<1x8x128xi1>
    %146 = vector.broadcast %cst_29 : f32 to vector<1x8x128xf32>
    %147 = arith.select %145, %142, %146 : vector<1x8x128xi1>, vector<1x8x128xf32>
    %148 = math.exp %147 : vector<1x8x128xf32>
    %149 = tpu.iota {dimensions = array<i32: 2>} : vector<1x1x128xi32>
    %c1_i32_30 = arith.constant 1 : i32
    %150 = vector.broadcast %c1_i32_30 : i32 to vector<1x1x128xi32>
    %151 = arith.cmpi eq, %149, %150 : vector<1x1x128xi32>
    %152 = arith.extui %151 : vector<1x1x128xi1> to vector<1x1x128xi32>
    %153 = arith.sitofp %152 : vector<1x1x128xi32> to vector<1x1x128xf32>
    %c0_i32_31 = arith.constant 0 : i32
    %154 = vector.broadcast %c0_i32_31 : i32 to vector<1x1x128xi32>
    %155 = arith.cmpi eq, %149, %154 : vector<1x1x128xi32>
    %156 = vector.shape_cast %111 : vector<1x128xf32> to vector<1x128x1xf32>
    %157 = vector.shape_cast %155 : vector<1x1x128xi1> to vector<1x1x128xi1>
    %158 = vector.broadcast %157 : vector<1x1x128xi1> to vector<1x128x128xi1>
    %159 = vector.shape_cast %156 : vector<1x128x1xf32> to vector<1x128x1xf32>
    %160 = vector.broadcast %159 : vector<1x128x1xf32> to vector<1x128x128xf32>
    %161 = vector.shape_cast %153 : vector<1x1x128xf32> to vector<1x1x128xf32>
    %162 = vector.broadcast %161 : vector<1x1x128xf32> to vector<1x128x128xf32>
    %163 = arith.select %158, %160, %162 : vector<1x128x128xi1>, vector<1x128x128xf32>
    "tpu.trace_start"() <{level = 10 : i32, message = "bqk,bkn->bqn"}> : () -> ()
    %cst_32 = arith.constant dense<0.000000e+00> : vector<1x8x128xf32>
    %164 = tpu.matmul %148, %163, %cst_32 {dimension_numbers = #tpu.dot_dimension_numbers<[2], [1], [1], [2], [0, 0, 0, 1, 1, 2], [0], [0]>, precision = #tpu.contract_precision<fp32>} : vector<1x8x128xf32>, vector<1x128x128xf32>, vector<1x8x128xf32> -> vector<1x8x128xf32>
    "tpu.trace_stop"() : () -> ()
    %165 = vector.extract_strided_slice %164 {offsets = [0, 0, 0], sizes = [1, 8, 1], strides = [1, 1, 1]} : vector<1x8x128xf32> to vector<1x8x1xf32>
    %166 = vector.shape_cast %165 : vector<1x8x1xf32> to vector<1x8xf32>
    %167 = vector.extract_strided_slice %164 {offsets = [0, 0, 1], sizes = [1, 8, 1], strides = [1, 1, 1]} : vector<1x8x128xf32> to vector<1x8x1xf32>
    %168 = vector.shape_cast %167 : vector<1x8x1xf32> to vector<1x8xf32>
    %169 = tpu.reciprocal %168 : vector<1x8xf32> -> vector<1x8xf32>
    %170 = arith.mulf %166, %169 : vector<1x8xf32>
    %171 = vector.broadcast %100 : f32 to vector<1x8xf32>
    %172 = arith.mulf %170, %171 : vector<1x8xf32>
    %173 = vector.broadcast %101 : f32 to vector<1x8xf32>
    %174 = arith.addf %172, %173 : vector<1x8xf32>
    %175 = tpu.iota {dimensions = array<i32: 1>} : vector<1x8xi32>
    %c8_i32_33 = arith.constant 8 : i32
    %176 = vector.broadcast %c8_i32_33 : i32 to vector<1x8xi32>
    %177 = arith.cmpi slt, %175, %176 : vector<1x8xi32>
    %cst_34 = arith.constant 0.000000e+00 : f32
    %178 = vector.broadcast %cst_34 : f32 to vector<1x8xf32>
    %179 = arith.select %177, %174, %178 : vector<1x8xi1>, vector<1x8xf32>
    %c0_35 = arith.constant 0 : index
    %c0_36 = arith.constant 0 : index
    %c0_37 = arith.constant 0 : index
    %180 = vector.load %arg3[%c0_35, %c0_36, %c0_37] : memref<1x1x128xf32, #tpu.memory_space<vmem>>, vector<1x1x8xf32>
    %181 = vector.shape_cast %180 : vector<1x1x8xf32> to vector<1x8xf32>
    %182 = arith.addf %181, %179 : vector<1x8xf32>
    %c0_38 = arith.constant 0 : index
    %c0_39 = arith.constant 0 : index
    %c0_40 = arith.constant 0 : index
    %183 = vector.load %arg3[%c0_38, %c0_39, %c0_40] : memref<1x1x128xf32, #tpu.memory_space<vmem>>, vector<1x1x8xf32>
    %184 = vector.shape_cast %183 : vector<1x1x8xf32> to vector<1x8xf32>
    %185 = vector.shape_cast %182 : vector<1x8xf32> to vector<1x1x8xf32>
    tpu.vector_store %arg3[%c0_38, %c0_39, %c0_40], %185 {strides = array<i32>} : memref<1x1x128xf32, #tpu.memory_space<vmem>>, vector<1x1x8xf32>,
    %c16 = arith.constant 16 : index
    %186 = memref.load %arg1[%c16] : memref<24xf32, #tpu.memory_space<smem>>
    %c17 = arith.constant 17 : index
    %187 = memref.load %arg1[%c17] : memref<24xf32, #tpu.memory_space<smem>>
    %c18 = arith.constant 18 : index
    %188 = memref.load %arg1[%c18] : memref<24xf32, #tpu.memory_space<smem>>
    %c19 = arith.constant 19 : index
    %189 = memref.load %arg1[%c19] : memref<24xf32, #tpu.memory_space<smem>>
    %c20 = arith.constant 20 : index
    %190 = memref.load %arg1[%c20] : memref<24xf32, #tpu.memory_space<smem>>
    %c21 = arith.constant 21 : index
    %191 = memref.load %arg1[%c21] : memref<24xf32, #tpu.memory_space<smem>>
    %c22 = arith.constant 22 : index
    %192 = memref.load %arg1[%c22] : memref<24xf32, #tpu.memory_space<smem>>
    %c23 = arith.constant 23 : index
    %193 = memref.load %arg1[%c23] : memref<24xf32, #tpu.memory_space<smem>>
    %c0_41 = arith.constant 0 : index
    %c2_42 = arith.constant 2 : index
    %c0_43 = arith.constant 0 : index
    %194 = vector.load %arg2[%c0_41, %c2_42, %c0_43] : memref<1x3x128xf32, #tpu.memory_space<vmem>>, vector<1x1x128xf32>
    %195 = vector.shape_cast %194 : vector<1x1x128xf32> to vector<1x128xf32>
    %196 = vector.broadcast %188 : f32 to vector<1x128xf32>
    %197 = arith.mulf %195, %196 : vector<1x128xf32>
    %198 = vector.broadcast %189 : f32 to vector<1x128xf32>
    %199 = arith.addf %197, %198 : vector<1x128xf32>
    %200 = vector.broadcast %190 : f32 to vector<1x128xf32>
    %201 = arith.mulf %195, %200 : vector<1x128xf32>
    %202 = vector.broadcast %191 : f32 to vector<1x128xf32>
    %203 = arith.addf %201, %202 : vector<1x128xf32>
    %204 = vector.extract_strided_slice %195 {offsets = [0, 0], sizes = [1, 16], strides = [1, 1]} : vector<1x128xf32> to vector<1x16xf32>
    %205 = vector.broadcast %186 : f32 to vector<1x16xf32>
    %206 = arith.mulf %204, %205 : vector<1x16xf32>
    %207 = vector.broadcast %187 : f32 to vector<1x16xf32>
    %208 = arith.addf %206, %207 : vector<1x16xf32>
    %209 = tpu.iota {dimensions = array<i32: 1>} : vector<1x128xi32>
    %c16_i32 = arith.constant 16 : i32
    %210 = vector.broadcast %c16_i32 : i32 to vector<1x128xi32>
    %211 = arith.cmpi slt, %209, %210 : vector<1x128xi32>
    %cst_44 = arith.constant -1.000000e+30 : f32
    %212 = vector.broadcast %cst_44 : f32 to vector<1x128xf32>
    %213 = arith.select %211, %199, %212 : vector<1x128xi1>, vector<1x128xf32>
    %cst_45 = arith.constant dense<0xFF800000> : vector<1xf32>
    %214 = vector.multi_reduction <maximumf>, %213, %cst_45 [1] : vector<1x128xf32> to vector<1xf32>
    %215 = vector.shape_cast %214 : vector<1xf32> to vector<1x1xf32>
    %cst_46 = arith.constant 1.000000e+30 : f32
    %216 = vector.broadcast %cst_46 : f32 to vector<1x128xf32>
    %217 = arith.select %211, %199, %216 : vector<1x128xi1>, vector<1x128xf32>
    %cst_47 = arith.constant dense<0x7F800000> : vector<1xf32>
    %218 = vector.multi_reduction <minimumf>, %217, %cst_47 [1] : vector<1x128xf32> to vector<1xf32>
    %219 = vector.shape_cast %218 : vector<1xf32> to vector<1x1xf32>
    %cst_48 = arith.constant 0.000000e+00 : f32
    %220 = vector.broadcast %cst_48 : f32 to vector<1x16xf32>
    %221 = arith.cmpf oge, %208, %220 : vector<1x16xf32>
    %222 = vector.broadcast %215 : vector<1x1xf32> to vector<1x16xf32>
    %223 = arith.mulf %208, %222 : vector<1x16xf32>
    %224 = vector.broadcast %219 : vector<1x1xf32> to vector<1x16xf32>
    %225 = arith.mulf %208, %224 : vector<1x16xf32>
    %226 = arith.select %221, %223, %225 : vector<1x16xi1>, vector<1x16xf32>
    %227 = vector.shape_cast %208 : vector<1x16xf32> to vector<1x16x1xf32>
    %228 = vector.shape_cast %199 : vector<1x128xf32> to vector<1x1x128xf32>
    %229 = vector.broadcast %227 : vector<1x16x1xf32> to vector<1x16x128xf32>
    %230 = vector.broadcast %228 : vector<1x1x128xf32> to vector<1x16x128xf32>
    %231 = arith.mulf %229, %230 : vector<1x16x128xf32>
    %232 = vector.shape_cast %226 : vector<1x16xf32> to vector<1x16x1xf32>
    %233 = vector.broadcast %232 : vector<1x16x1xf32> to vector<1x16x128xf32>
    %234 = arith.subf %231, %233 : vector<1x16x128xf32>
    %235 = vector.shape_cast %211 : vector<1x128xi1> to vector<1x1x128xi1>
    %cst_49 = arith.constant -1.000000e+30 : f32
    %236 = vector.shape_cast %235 : vector<1x1x128xi1> to vector<1x1x128xi1>
    %237 = vector.broadcast %236 : vector<1x1x128xi1> to vector<1x16x128xi1>
    %238 = vector.broadcast %cst_49 : f32 to vector<1x16x128xf32>
    %239 = arith.select %237, %234, %238 : vector<1x16x128xi1>, vector<1x16x128xf32>
    %240 = math.exp %239 : vector<1x16x128xf32>
    %241 = tpu.iota {dimensions = array<i32: 2>} : vector<1x1x128xi32>
    %c1_i32_50 = arith.constant 1 : i32
    %242 = vector.broadcast %c1_i32_50 : i32 to vector<1x1x128xi32>
    %243 = arith.cmpi eq, %241, %242 : vector<1x1x128xi32>
    %244 = arith.extui %243 : vector<1x1x128xi1> to vector<1x1x128xi32>
    %245 = arith.sitofp %244 : vector<1x1x128xi32> to vector<1x1x128xf32>
    %c0_i32_51 = arith.constant 0 : i32
    %246 = vector.broadcast %c0_i32_51 : i32 to vector<1x1x128xi32>
    %247 = arith.cmpi eq, %241, %246 : vector<1x1x128xi32>
    %248 = vector.shape_cast %203 : vector<1x128xf32> to vector<1x128x1xf32>
    %249 = vector.shape_cast %247 : vector<1x1x128xi1> to vector<1x1x128xi1>
    %250 = vector.broadcast %249 : vector<1x1x128xi1> to vector<1x128x128xi1>
    %251 = vector.shape_cast %248 : vector<1x128x1xf32> to vector<1x128x1xf32>
    %252 = vector.broadcast %251 : vector<1x128x1xf32> to vector<1x128x128xf32>
    %253 = vector.shape_cast %245 : vector<1x1x128xf32> to vector<1x1x128xf32>
    %254 = vector.broadcast %253 : vector<1x1x128xf32> to vector<1x128x128xf32>
    %255 = arith.select %250, %252, %254 : vector<1x128x128xi1>, vector<1x128x128xf32>
    "tpu.trace_start"() <{level = 10 : i32, message = "bqk,bkn->bqn"}> : () -> ()
    %cst_52 = arith.constant dense<0.000000e+00> : vector<1x16x128xf32>
    %256 = tpu.matmul %240, %255, %cst_52 {dimension_numbers = #tpu.dot_dimension_numbers<[2], [1], [1], [2], [0, 0, 0, 1, 1, 2], [0], [0]>, precision = #tpu.contract_precision<fp32>} : vector<1x16x128xf32>, vector<1x128x128xf32>, vector<1x16x128xf32> -> vector<1x16x128xf32>
    "tpu.trace_stop"() : () -> ()
    %257 = vector.extract_strided_slice %256 {offsets = [0, 0, 0], sizes = [1, 16, 1], strides = [1, 1, 1]} : vector<1x16x128xf32> to vector<1x16x1xf32>
    %258 = vector.shape_cast %257 : vector<1x16x1xf32> to vector<1x16xf32>
    %259 = vector.extract_strided_slice %256 {offsets = [0, 0, 1], sizes = [1, 16, 1], strides = [1, 1, 1]} : vector<1x16x128xf32> to vector<1x16x1xf32>
    %260 = vector.shape_cast %259 : vector<1x16x1xf32> to vector<1x16xf32>
    %261 = tpu.reciprocal %260 : vector<1x16xf32> -> vector<1x16xf32>
    %262 = arith.mulf %258, %261 : vector<1x16xf32>
    %263 = vector.broadcast %192 : f32 to vector<1x16xf32>
    %264 = arith.mulf %262, %263 : vector<1x16xf32>
    %265 = vector.broadcast %193 : f32 to vector<1x16xf32>
    %266 = arith.addf %264, %265 : vector<1x16xf32>
    %267 = tpu.iota {dimensions = array<i32: 1>} : vector<1x16xi32>
    %c16_i32_53 = arith.constant 16 : i32
    %268 = vector.broadcast %c16_i32_53 : i32 to vector<1x16xi32>
    %269 = arith.cmpi slt, %267, %268 : vector<1x16xi32>
    %cst_54 = arith.constant 0.000000e+00 : f32
    %270 = vector.broadcast %cst_54 : f32 to vector<1x16xf32>
    %271 = arith.select %269, %266, %270 : vector<1x16xi1>, vector<1x16xf32>
    %c0_55 = arith.constant 0 : index
    %c0_56 = arith.constant 0 : index
    %c0_57 = arith.constant 0 : index
    %272 = vector.load %arg3[%c0_55, %c0_56, %c0_57] : memref<1x1x128xf32, #tpu.memory_space<vmem>>, vector<1x1x16xf32>
    %273 = vector.shape_cast %272 : vector<1x1x16xf32> to vector<1x16xf32>
    %274 = arith.addf %273, %271 : vector<1x16xf32>
    %c0_58 = arith.constant 0 : index
    %c0_59 = arith.constant 0 : index
    %c0_60 = arith.constant 0 : index
    %275 = vector.load %arg3[%c0_58, %c0_59, %c0_60] : memref<1x1x128xf32, #tpu.memory_space<vmem>>, vector<1x1x16xf32>
    %276 = vector.shape_cast %275 : vector<1x1x16xf32> to vector<1x16xf32>
    %277 = vector.shape_cast %274 : vector<1x16xf32> to vector<1x1x16xf32>
    tpu.vector_store %arg3[%c0_58, %c0_59, %c0_60], %277 {strides = array<i32>} : memref<1x1x128xf32, #tpu.memory_space<vmem>>, vector<1x1x16xf32>,
    return
  }
  func.func @transform_0(%arg0: i32) -> i32 {
    %c0_i32 = arith.constant 0 : i32
    %c0_i32_0 = arith.constant 0 : i32
    return %c0_i32 : i32
  }
  func.func @transform_1(%arg0: i32) -> (i32, i32, i32) {
    %c0_i32 = arith.constant 0 : i32
    %c0_i32_0 = arith.constant 0 : i32
    %c0_i32_1 = arith.constant 0 : i32
    return %arg0, %c0_i32, %c0_i32_0 : i32, i32, i32
  }
  func.func @transform_2(%arg0: i32) -> (i32, i32, i32) {
    %c0_i32 = arith.constant 0 : i32
    %c0_i32_0 = arith.constant 0 : i32
    %c0_i32_1 = arith.constant 0 : i32
    return %arg0, %c0_i32, %c0_i32_0 : i32, i32, i32
  }
}

</mosaic_0001>

<bundles_post_ra>
// kernel: tpu_custom_call.1
= control target key start
LH: loop header
LB: loop body
LE: loop exit
PB: predicated region body
PF: predicated region fallthrough
CT: control target
= control target key end

     0   :  { %7 = vsyncpa [#allocation4], 0  ;;  %s5800_s0 = inlined_call_operand.vmem [shape: f32[24], index: 0, kind: input, shape index: {}]   ;;  %s5801_s1 = inlined_call_operand.vmem [shape: f32[2,3,128], index: 1, kind: input, shape index: {}]   ;;  %s5802_s2 = inlined_call_operand.hbm [shape: f32[2,1,128], index: 2, kind: output, shape index: {}]  }
   0x1   :  { %8 = vsyncpa [#allocation3], 0 }
   0x2   :  { %10 = vsyncpa [#allocation3 + $0x1], 0  ;;  %s4400_s9 = smov 0   ;;  %s4402_s10 = smov 0  }
   0x3   :  { %s4404_s11 = smov 0   ;;  %s4406_s12 = smov 0  }
   0x4 LB: > { %s4421_s13 = sadd.s32 4294967295, %s4376_s12   ;;  %s2737_s14 = sadd.s32 4294967294, %s4376_s12   ;;  %s4376_s12 = sphi %s4406_s12, %s5981_s12   ;;  %s4372_s11 = sphi %s4404_s11, %s5980_s11   ;;  %s4368_s10 = sphi %s4402_s10, %s5979_s10   ;;  %s4364_s9 = sphi %s4400_s9, %s5978_s9  }
   0x5   : > { %s4425_s15 = sadd.s32 1, %s4376_s12   ;;  %s70_s16 = sadd.s32 1, %s4372_s11 }
   0x6   : > { %s67_s17 = ssub.s32 %s4376_s12, %s4425_s15  ;;  %p80_p0 = scmp.ne.s32.totalorder %s4372_s11, %s4368_s10 }
   0x7   : > { %p68_p1 = scmp.eq.s32.totalorder %s67_s17, 0  ;;  %p81_p2 = scmp.eq.s32.totalorder %s4421_s13, 1 }
   0x8   : > { %p86_p3 = scmp.ne.s32.totalorder %s4368_s10, %s4364_s9  ;;  %p87_p4 = scmp.eq.s32.totalorder %s2737_s14, 1 }
   0x9   : > { %s4436_s18 = scalar_select %p68_p1, %s4372_s11, %s70_s16  }
   0xa   : > { %p4438_p5 = por %p81_p2, %p80_p0  ;;  %p4442_p6 = por %p87_p4, %p86_p3 }
   0xb   : > { %p2738_p7 = scmp.ge.s32.totalorder %s4376_s12, 1  ;;  %p94_p8 = scmp.lt.s32.totalorder %s4376_s12, 3 }
   0xc   : > { %p4236_p9 = scmp.eq.s32.totalorder %s4421_s13, 0  ;;  %s107_s24 = sshll.u32 %s5800_s0, 4  ;;  %s108_s24 = int_to_ptr.vmem [resolvable:$true] %s107_s24 }
   0xd   : > { %p4449_p10 = pnand %p2738_p7, %p94_p8  ;;  %s4295_s25 = scalar_lea.vmem %s108_s24, 16 }
   0xe   : > { %p4296_p13 = scmp.ne.s32.totalorder %s108_s24, %s4295_s25  ;;  %p4303_p3 = scmp.lt.s32.totalorder %s108_s24, %s108_s24 }
   0xf   : > { %p4228_p11 = pneg %p4449_p10  ;;  %p4304_p4 = scmp.lt.s32.totalorder %s4295_s25, %s4295_s25 }
  0x11   : > { %p4229_p12 = pnand %p4236_p9, %p4228_p11  ;;  %p4305_p7 = por %p4304_p4, %p4303_p3 }
  0x13   : > { %p4297_p0 = pneg %p4229_p12 }
  0x15   : > { %p4298_p1 = pnand %p4297_p0, %p4296_p13 }
  0x17   : > { %p4299_p2 = pneg %p4298_p1 }
  0x19   : > { %p4306_p8 = pnand %p4305_p7, %p4299_p2 }
  0x1b   : > { %4309 = shalt.err (!%p4306_p8)
}
  0x1c   : > { %s4378_s26 = smov [#allocation2]   ;;  %127 = sbr.rel (%p4449_p10) target bundleno = 1187 (0x4a3), region = 28 }
  0x1d   : > { %4231 = dma.vmem_to_smem (!%p4229_p12), %s108_s24, 16, %s4378_s26, [#allocation4]  }
  0x23   : > { %4355 = dma.done.wait (%p4236_p9), [#allocation4], 16  }
  0x24   : > { %4357 = vsyncadd (%p4236_p9), [#allocation4], 4294967280 }
  0x25   : > { %133 = sfence }
  0x26   : > { %p148_p11 = scmp.lt.s32.totalorder %s4421_s13, 1  ;;  %s2745_s27 = sld [smem:[#allocation2 + $0x2]]  ;;  %v174_v0 = vlaneseq  ;;  %vm178_vm1 = vcmask 1040384   ;;  %v5806_v23 = vmov 0.0|0.0   ;;  %v5803_v50 = vmov 0.0  }
  0x27   : > { %s2746_s28 = sld [smem:[#allocation2 + $0x3]]  ;;  %s2747_s29 = sld [smem:[#allocation2 + $0x4]]  ;;  %3713 = vmatprep.subr.bf16.mxu1 %v5806_v23  ;;  %3785 = vmatprep.subr.bf16.mxu0 %v5806_v23  ;;  %vm4381_vm7 = vmmov 0   ;;  %vm967_vm10 = vcmask 57344   ;;  %vm2649_vm11 = vcmask 130112   ;;  %vm2655_vm12 = vcmask 122880  }
  0x28   : > { %s149_s30 = scalar_select %p148_p11, %s4421_s13, 1  ;;  %v4468_v1 = vand.u32 127, %v174_v0  ;;  %v4470_v2 = vshrl.u32 %v174_v0, 7  ;;  %3220 = vmatprep.mubr.msk.f32.mxu0 %vm4381_vm7, %v5803_v50  ;;  %3115 = vmatprep.mubr.msk.f32.mxu1 %vm4381_vm7, %v5803_v50 }
  0x29   : > { %s2748_s3 = sld [smem:[#allocation2 + $0x5]]  ;;  %s153_s8 = sld [smem:[#allocation2]] }
  0x2a   : > { %s2743_s4 = sshll.u32 %s149_s30, 2  ;;  %5879 = vst [vmem:[#allocation8_spill] sm:$0xff] %v4468_v1  ;;  %5880 = vst [vmem:[#allocation9_spill] sm:$0xff] %v4470_v2  ;;  %vm176_vm0 = vcmp.lt.s32.totalorder %v4468_v1, 4  ;;  %v4480_v9 = vsub.s32 0, %v4470_v2  ;;  %s2744_s14 = sld [smem:[#allocation2 + $0x1]] }
  0x2b   : > { %s4475_s7 = scalar_lea.vmem %s5801_s1, %s2743_s4  ;;  %s2754_s16 = sld [smem:[#allocation2 + $0xa]]  ;;  %vm990_vm2 = vcmp.lt.s32.totalorder %v4468_v1, 8  ;;  %vm1796_vm3 = vcmp.lt.s32.totalorder %v4468_v1, 16  ;;  %vm215_vm4 = vcmp.eq.s32.totalorder %v4468_v1, 1  ;;  %vm218_vm5 = vcmp.eq.s32.totalorder %v4468_v1, 0 }
  0x2c   : > { %v161_v3 = vld [vmem:[%s4475_s7] sm:$0x1]  ;;  %v162_v4 = vstv %s2745_s27  ;;  %s2755_s17 = sld [smem:[#allocation2 + $0xb]]  ;;  %s2762_s21 = sld [smem:[#allocation2 + $0x12]]  ;;  %v4500_v24 = vld [vmem:[%s4475_s7 + $0x1] sm:$0x1] }
  0x2d   : > { %v163_v5 = vmul.f32 %v162_v4, %v161_v3  ;;  %v164_v6 = vstv %s2746_s28  ;;  %v166_v7 = vstv %s2747_s29  ;;  %s2763_s22 = sld [smem:[#allocation2 + $0x13]]  ;;  %v1783_v28 = vld [vmem:[%s4475_s7 + $0x2] sm:$0x1]  ;;  %s2756_s23 = sld [smem:[#allocation2 + $0xc]]  ;;  %v4534_v51 = vsel %vm215_vm4, 1.0, %v5803_v50 }
  0x2e   : > { %v167_v8 = vmul.f32 %v166_v7, %v161_v3  ;;  %s2757_s24 = sld [smem:[#allocation2 + $0xd]]  ;;  %s2764_s25 = sld [smem:[#allocation2 + $0x14]] }
  0x2f   : > { %v4482_v10 = vadd.f32 %v164_v6, %v163_v5  ;;  %v168_v11 = vstv %s2748_s3  ;;  %v170_v18 = vstv %s153_s8  ;;  %s2765_s26 = sld [smem:[#allocation2 + $0x15]]  ;;  %s2760_s27 = sld [smem:[#allocation2 + $0x10]] }
  0x30   : > { %v169_v12 = vadd.f32 %v168_v11, %v167_v8  ;;  %v171_v19 = vmul.f32 %v170_v18, %v161_v3  ;;  %v172_v20 = vstv %s2744_s14  ;;  %s2761_s28 = sld [smem:[#allocation2 + $0x11]]  ;;  %s2752_s29 = sld [smem:[#allocation2 + $0x8]] }
  0x31   : > { %v177_v13 = vsel %vm176_vm0, %v4482_v10, -1e+30  ;;  %v182_v14 = vsel %vm176_vm0, %v4482_v10, 1e+30  ;;  %v978_v25 = vstv %s2754_s16  ;;  %s2753_s30 = sld [smem:[#allocation2 + $0x9]]  ;;  %s4382_s3 = smov 127  }
  0x32   : > { %v179_v15 = vsel %vm178_vm1, %v177_v13, -inf  ;;  %v222_v16 = vrot.slane %v169_v12, %v4480_v9  ;;  %v183_v17 = vsel %vm178_vm1, %v182_v14, inf  ;;  %v4493_v21 = vadd.f32 %v172_v20, %v171_v19  ;;  %s2749_s4 = sld [smem:[#allocation2 + $0x6]]  ;;  %s2750_s5 = sld [smem:[#allocation2 + $0x7]] }
  0x33   : > { %180 = vmax.xlane.f32.xlu0 %v179_v15  ;;  %v979_v26 = vmul.f32 %v978_v25, %v4500_v24  ;;  %v980_v27 = vstv %s2755_s17  ;;  %v1784_v29 = vstv %s2762_s21  ;;  %v1786_v32 = vstv %s2763_s22  ;;  %s146_s6 = sand.u32 1, %s4368_s10   ;;  %s2758_s8 = sld [smem:[#allocation2 + $0xe]] }
  0x34   : > { %224 = vbcast.lane.b32.xlu1 %v222_v16, 256  ;;  %v193_v22 = vrot.slane %v4493_v21, %v4480_v9  ;;  %v1785_v31 = vmul.f32 %v1784_v29, %v1783_v28  ;;  %v982_v40 = vstv %s2756_s23  ;;  %v984_v42 = vstv %s2757_s24  ;;  %s5731_s7 = scalar_lea.vmem [#allocation5], %s146_s6  ;;  %s2759_s14 = sld [smem:[#allocation2 + $0xf]] }
  0x35   : > { %v4504_v30 = vadd.f32 %v980_v27, %v979_v26  ;;  %v983_v41 = vmul.f32 %v982_v40, %v4500_v24  ;;  %v1788_v44 = vstv %s2764_s25  ;;  %v1790_v47 = vstv %s2765_s26  ;;  %s2766_s16 = sld [smem:[#allocation2 + $0x16]]  ;;  %s2767_s17 = sld [smem:[#allocation2 + $0x17]] }
  0x36   : > { %v4513_v35 = vadd.f32 %v1786_v32, %v1785_v31  ;;  %v1789_v46 = vmul.f32 %v1788_v44, %v1783_v28  ;;  %v1792_v57 = vstv %s2760_s27  ;;  %v1794_v4 = vstv %s2761_s28  ;;  %s2768_s21 = sshll.u32 %s4421_s13, 4  ;;  %s2670_s22 = sshll.u32 %s5731_s7, 4  ;;  %s5757_s22 = int_to_ptr.vmem [resolvable:$true] %s2670_s22 }
  0x37   : > { %184 = vmin.xlane.f32.xlu0 %v183_v17  ;;  %v991_v33 = vsel %vm990_vm2, %v4504_v30, -1e+30  ;;  %v995_v34 = vsel %vm990_vm2, %v4504_v30, 1e+30  ;;  %v985_v43 = vadd.f32 %v984_v42, %v983_v41  ;;  %v1793_v61 = vmul.f32 %v1792_v57, %v1783_v28  ;;  %s5755_s25 = scalar_lea.hbm %s5802_s2, %s2768_s21  ;;  %s2658_s13 = scalar_lea.sflag [#allocation3], %s146_s6 }
  0x38   : > { %228 = vbcast.lane.b32.xlu1 %v222_v16, 264  ;;  %v992_v36 = vsel %vm178_vm1, %v991_v33, -inf  ;;  %v996_v37 = vsel %vm178_vm1, %v995_v34, inf  ;;  %v1797_v38 = vsel %vm1796_vm3, %v4513_v35, -1e+30  ;;  %v1791_v48 = vadd.f32 %v1790_v47, %v1789_v46  ;;  %s4310_s26 = scalar_lea.vmem %s5757_s22, 16 }
  0x39   : > { %v1798_v39 = vsel %vm178_vm1, %v1797_v38, -inf  ;;  %v4524_v45 = vrot.slane %v985_v43, %v4480_v9  ;;  %v4567_v11 = vadd.f32 %v1794_v4, %v1793_v61  ;;  %v200_v28 = vrot.slane %v4482_v10, %v4480_v9  ;;  %p4311_p9 = scmp.ne.s32.totalorder %s5757_s22, %s4310_s26  ;;  %s4384_s27 = smov [#allocation5]  }
  0x3a   : > { %v4528_v49 = vrot.slane %v1791_v48, %v4480_v9  ;;  %vm186_vm6 = vcmp.ge.f32.partialorder %v4493_v21, 0.0  ;;  %s4314_s28 = sshll.u32 %s4384_s27, 4  ;;  %s4315_s28 = int_to_ptr.vmem [resolvable:$false] %s4314_s28 }
  0x3b   : > { %v4590_v25 = vrot.slane %v4567_v11, %v4480_v9  ;;  %vm1805_vm9 = vcmp.ge.f32.partialorder %v4567_v11, 0.0  ;;  %p4312_p10 = pnand %p4311_p9, %p4438_p5  ;;  %p4317_p13 = scmp.lt.s32.totalorder %s5757_s22, %s4315_s28 }
  0x3c   : > { %236 = vbcast.lane.b32.xlu1 %v222_v16, 280 }
  0x3d   : > { %p4313_p12 = pneg %p4312_p10 }
  0x40   : > { %240 = vbcast.lane.b32.xlu1 %v222_v16, 288 }
  0x44   : > { %244 = vbcast.lane.b32.xlu1 %v222_v16, 296 }
  0x48   : > { %195 = vbcast.lane.b32.xlu1 %v193_v22, 256 }
  0x4c   : > { %248 = vbcast.lane.b32.xlu1 %v222_v16, 304 }
  0x4d   : > { %232 = vbcast.lane.b32.xlu0 %v222_v16, 272 }
  0x50   : > { %256 = vbcast.lane.b32.xlu1 %v222_v16, 320 }
  0x51   : > { %252 = vbcast.lane.b32.xlu0 %v222_v16, 312 }
  0x54   : > { %264 = vbcast.lane.b32.xlu1 %v222_v16, 336 }
  0x55   : > { %260 = vbcast.lane.b32.xlu0 %v222_v16, 328 }
  0x58   : > { %272 = vbcast.lane.b32.xlu1 %v222_v16, 352 }
  0x59   : > { %268 = vbcast.lane.b32.xlu0 %v222_v16, 344 }
  0x5c   : > { %280 = vbcast.lane.b32.xlu1 %v222_v16, 368 }
  0x5d   : > { %276 = vbcast.lane.b32.xlu0 %v222_v16, 360 }
  0x61   : > { %284 = vbcast.lane.b32.xlu0 %v222_v16, 376 }
  0x80   : > { %993 = vmax.xlane.f32.xlu1 %v992_v36  ;;  %997 = vmin.xlane.f32.xlu0 %v996_v37 }
  0x84   : > { %1799 = vmax.xlane.f32.xlu0 %v1798_v39 }
  0x9a   : > { %1033 = vbcast.lane.b32.xlu0 %v4524_v45, 256 }
  0x9e   : > { %1045 = vbcast.lane.b32.xlu0 %v4524_v45, 280 }
  0xa2   : > { %1856 = vbcast.lane.b32.xlu0 %v4528_v49, 264 }
  0xa6   : > { %v225_v52 = vpop.permute.xlu1 %224  ;;  %1053 = vbcast.lane.b32.xlu0 %v4524_v45, 296 }
  0xa7   : > { %v288_v53 = vsel %vm218_vm5, %v225_v52, %v4534_v51 }
  0xa8   : > { %v305_v54 = vand.u32 4294901760, %v288_v53 }
  0xaa   : > { %v4541_v55 = vsub.f32 %v288_v53, %v305_v54  ;;  %v229_v56 = vpop.permute.xlu1 %228  ;;  %1864 = vbcast.lane.b32.xlu0 %v4528_v49, 280 }
  0xab   : > { %v289_v58 = vsel %vm218_vm5, %v229_v56, %v4534_v51 }
  0xac   : > { %v398_v59 = vand.u32 4294901760, %v4541_v55  ;;  %v308_v60 = vand.u32 4294901760, %v289_v58 }
  0xae   : > { %v399_v62 = vsub.f32 %v4541_v55, %v398_v59  ;;  %v4549_v63 = vsub.f32 %v289_v58, %v308_v60  ;;  %v237_v0 = vpop.permute.xlu1 %236  ;;  %v4551_v3 = vpack.c.bf16 %v308_v60, %v305_v54  ;;  %1061 = vbcast.lane.b32.xlu0 %v4524_v45, 312 }
  0xaf   : > { %v4557_v5 = vsel %vm218_vm5, %v237_v0, %v4534_v51 }
  0xb0   : > { %v405_v6 = vand.u32 4294901760, %v4549_v63  ;;  %v314_v8 = vand.u32 4294901760, %v4557_v5  ;;  %3715 = vmatpush3.bf16.msra.mxu1 %v4551_v3  ;;  %3787 = vmatpush3.bf16.msra.mxu0 %v4551_v3  ;;  %v400_v12 = vand.u32 4294901760, %v399_v62 }
  0xb1   : > { %3716 = vmatprep.subr.bf16.mxu1 %v5806_v23  ;;  %3788 = vmatprep.subr.bf16.mxu0 %v5806_v23 }
  0xb2   : > { %v406_v13 = vsub.f32 %v4549_v63, %v405_v6  ;;  %v4573_v14 = vsub.f32 %v4557_v5, %v314_v8  ;;  %v241_v15 = vpop.permute.xlu1 %240  ;;  %1872 = vbcast.lane.b32.xlu0 %v4528_v49, 296  ;;  %v4576_v16 = vpack.c.bf16 %v405_v6, %v398_v59 }
  0xb3   : > { %v4581_v17 = vsel %vm218_vm5, %v241_v15, %v4534_v51 }
  0xb4   : > { %v407_v18 = vand.u32 4294901760, %v406_v13  ;;  %v317_v19 = vand.u32 4294901760, %v4581_v17  ;;  %v419_v4 = vand.u32 4294901760, %v4573_v14 }
  0xb6   : > { %v4585_v20 = vsub.f32 %v4581_v17, %v317_v19  ;;  %v245_v22 = vpop.permute.xlu1 %244  ;;  %1069 = vbcast.lane.b32.xlu0 %v4524_v45, 328  ;;  %v4592_v26 = vpack.c.bf16 %v407_v18, %v400_v12 }
  0xb7   : > { %v293_v27 = vsel %vm218_vm5, %v245_v22, %v4534_v51 }
  0xb8   : > { %v426_v29 = vand.u32 4294901760, %v4585_v20  ;;  %v320_v31 = vand.u32 4294901760, %v293_v27 }
  0xba   : > { %v427_v32 = vsub.f32 %v4585_v20, %v426_v29  ;;  %v4601_v33 = vsub.f32 %v293_v27, %v320_v31  ;;  %v196_v34 = vpop.permute.xlu1 %195  ;;  %1818 = vbcast.lane.b32.xlu0 %v4590_v25, 264  ;;  %v420_v27 = vsub.f32 %v4573_v14, %v419_v4 }
  0xbb   : > { %v4604_v36 = vmul.f32 %v200_v28, %v196_v34 }
  0xbc   : > { %v433_v37 = vand.u32 4294901760, %v4601_v33  ;;  %v428_v39 = vand.u32 4294901760, %v427_v32 }
  0xbe   : > { %v434_v10 = vsub.f32 %v4601_v33, %v433_v37  ;;  %v249_v40 = vpop.permute.xlu1 %248  ;;  %1880 = vbcast.lane.b32.xlu0 %v4528_v49, 312  ;;  %v4611_v41 = vpack.c.bf16 %v433_v37, %v426_v29 }
  0xbf   : > { %v294_v42 = vsel %vm218_vm5, %v249_v40, %v4534_v51  ;;  %v4674_v40 = vpack.c.bf16 %v320_v31, %v317_v19  ;;  %v421_v19 = vand.u32 4294901760, %v420_v27 }
  0xc0   : > { %v181_v43 = vpop.xlane.xlu0 %180  ;;  %v435_v44 = vand.u32 4294901760, %v434_v10  ;;  %v323_v46 = vand.u32 4294901760, %v294_v42 }
  0xc1   : > { %v187_v57 = vmul.f32 %v181_v43, %v4493_v21 }
  0xc2   : > { %v4616_v47 = vsub.f32 %v294_v42, %v323_v46  ;;  %v257_v48 = vpop.permute.xlu1 %256  ;;  %1077 = vbcast.lane.b32.xlu0 %v4524_v45, 344  ;;  %v4619_v52 = vpack.c.bf16 %v435_v44, %v428_v39 }
  0xc3   : > { %v4624_v53 = vsel %vm218_vm5, %v257_v48, %v4534_v51 }
  0xc4   : > { %v185_v54 = vpop.xlane.xlu0 %184  ;;  %v329_v56 = vand.u32 4294901760, %v4624_v53  ;;  %v440_v18 = vand.u32 4294901760, %v4616_v47 }
  0xc5   : > { %v188_v58 = vmul.f32 %v185_v54, %v4493_v21 }
  0xc6   : > { %v4633_v59 = vsub.f32 %v4624_v53, %v329_v56  ;;  %v265_v60 = vpop.permute.xlu1 %264  ;;  %1888 = vbcast.lane.b32.xlu0 %v4528_v49, 328  ;;  %v441_v42 = vsub.f32 %v4616_v47, %v440_v18 }
  0xc7   : > { %v189_v61 = vsel %vm186_vm6, %v187_v57, %v188_v58  ;;  %v4639_v62 = vsel %vm218_vm5, %v265_v60, %v4534_v51 }
  0xc8   : > { %v205_v0 = vrot.slane %v189_v61, %v4480_v9  ;;  %v233_v6 = vpop.permute.xlu0 %232  ;;  %v335_v21 = vand.u32 4294901760, %v4639_v62  ;;  %v454_v54 = vand.u32 4294901760, %v4633_v59  ;;  %v442_v27 = vand.u32 4294901760, %v441_v42 }
  0xc9   : > { %v290_v12 = vsel %vm218_vm5, %v233_v6, %v4534_v51 }
  0xca   : > { %207 = vbcast.lane.b32.xlu1 %v205_v0, 256  ;;  %v311_v13 = vand.u32 4294901760, %v290_v12  ;;  %v4650_v15 = vsub.f32 %v4639_v62, %v335_v21  ;;  %v273_v17 = vpop.permute.xlu1 %272 }
  0xcb   : > { %v4656_v22 = vsel %vm218_vm5, %v273_v17, %v4534_v51 }
  0xcc   : > { %v4659_v28 = vsub.f32 %v290_v12, %v311_v13  ;;  %v4663_v29 = vpack.c.bf16 %v314_v8, %v311_v13  ;;  %v253_v32 = vpop.permute.xlu0 %252  ;;  %v341_v37 = vand.u32 4294901760, %v4656_v22 }
  0xcd   : > { %v295_v34 = vsel %vm218_vm5, %v253_v32, %v4534_v51  ;;  %v468_v32 = vand.u32 4294901760, %v4650_v15 }
  0xce   : > { %v412_v39 = vand.u32 4294901760, %v4659_v28  ;;  %3718 = vmatpush3.bf16.msra.mxu1 %v4663_v29  ;;  %3790 = vmatpush3.bf16.msra.mxu0 %v4663_v29  ;;  %v326_v5 = vand.u32 4294901760, %v295_v34  ;;  %v281_v8 = vpop.permute.xlu1 %280  ;;  %v4682_v43 = vsub.f32 %v4656_v22, %v341_v37 }
  0xcf   : > { %3719 = vmatprep.subr.bf16.mxu1 %v5806_v23  ;;  %3791 = vmatprep.subr.bf16.mxu0 %v5806_v23  ;;  %v4687_v44 = vsel %vm218_vm5, %v281_v8, %v4534_v51 }
  0xd0   : > { %v413_v31 = vsub.f32 %v4659_v28, %v412_v39  ;;  %v4690_v48 = vsub.f32 %v295_v34, %v326_v5  ;;  %v261_v57 = vpop.permute.xlu0 %260  ;;  %v4700_v60 = vpack.c.bf16 %v326_v5, %v323_v46  ;;  %v5805_v61 = vand.u32 4294901760, %v4687_v44 }
  0xd1   : > { %v297_v58 = vsel %vm218_vm5, %v261_v57, %v4534_v51  ;;  %v4703_v0 = vpack.c.bf16 %v419_v4, %v412_v39  ;;  %v455_v34 = vsub.f32 %v4633_v59, %v454_v54 }
  0xd2   : > { %v414_v6 = vand.u32 4294901760, %v413_v31  ;;  %3721 = vmatpush3.bf16.msra.mxu1 %v4674_v40  ;;  %3793 = vmatpush3.bf16.msra.mxu0 %v4674_v40  ;;  %v447_v12 = vand.u32 4294901760, %v4690_v48  ;;  %v332_v17 = vand.u32 4294901760, %v297_v58  ;;  %v4716_v46 = vsub.f32 %v4687_v44, %v5805_v61 }
  0xd3   : > { %3722 = vmatprep.subr.bf16.mxu1 %v5806_v23  ;;  %3794 = vmatprep.subr.bf16.mxu0 %v5806_v23  ;;  %v456_v53 = vand.u32 4294901760, %v455_v34 }
  0xd4   : > { %v448_v4 = vsub.f32 %v4690_v48, %v447_v12  ;;  %v4720_v39 = vsub.f32 %v297_v58, %v332_v17  ;;  %v269_v5 = vpop.permute.xlu0 %268  ;;  %v4722_v8 = vpack.c.bf16 %v421_v19, %v414_v6  ;;  %v4729_v31 = vpack.c.bf16 %v332_v17, %v329_v56 }
  0xd5   : > { %v299_v42 = vsel %vm218_vm5, %v269_v5, %v4534_v51  ;;  %v4731_v57 = vpack.c.bf16 %v447_v12, %v440_v18  ;;  %v469_v19 = vsub.f32 %v4650_v15, %v468_v32  ;;  %v482_v6 = vand.u32 4294901760, %v4682_v43 }
  0xd6   : > { %v449_v13 = vand.u32 4294901760, %v448_v4  ;;  %v461_v38 = vand.u32 4294901760, %v4720_v39  ;;  %v338_v10 = vand.u32 4294901760, %v299_v42  ;;  %3724 = vmatpush3.bf16.msra.mxu1 %v4700_v60  ;;  %3796 = vmatpush3.bf16.msra.mxu0 %v4700_v60 }
  0xd7   : > { %3725 = vmatprep.subr.bf16.mxu1 %v5806_v23  ;;  %3797 = vmatprep.subr.bf16.mxu0 %v5806_v23 }
  0xd8   : > { %v462_v56 = vsub.f32 %v4720_v39, %v461_v38  ;;  %v4743_v18 = vsub.f32 %v299_v42, %v338_v10  ;;  %v277_v12 = vpop.permute.xlu0 %276  ;;  %v4745_v17 = vpack.c.bf16 %v449_v13, %v442_v27  ;;  %v4752_v5 = vpack.c.bf16 %v338_v10, %v335_v21 }
  0xd9   : > { %v301_v4 = vsel %vm218_vm5, %v277_v12, %v4534_v51  ;;  %v4754_v58 = vpack.c.bf16 %v461_v38, %v454_v54  ;;  %v470_v13 = vand.u32 4294901760, %v469_v19  ;;  %v483_v27 = vsub.f32 %v4682_v43, %v482_v6 }
  0xda   : > { %v463_v7 = vand.u32 4294901760, %v462_v56  ;;  %v475_v34 = vand.u32 4294901760, %v4743_v18  ;;  %v344_v50 = vand.u32 4294901760, %v301_v4  ;;  %3727 = vmatpush3.bf16.msra.mxu1 %v4729_v31  ;;  %3799 = vmatpush3.bf16.msra.mxu0 %v4729_v31  ;;  %v496_v21 = vand.u32 4294901760, %v4716_v46 }
  0xdb   : > { %3728 = vmatprep.subr.bf16.mxu1 %v5806_v23  ;;  %3800 = vmatprep.subr.bf16.mxu0 %v5806_v23 }
  0xdc   : > { %v476_v38 = vsub.f32 %v4743_v18, %v475_v34  ;;  %v4765_v62 = vsub.f32 %v301_v4, %v344_v50  ;;  %v285_v10 = vpop.permute.xlu0 %284  ;;  %v4768_v54 = vpack.c.bf16 %v463_v7, %v456_v53  ;;  %v4775_v19 = vpack.c.bf16 %v344_v50, %v341_v37 }
  0xdd   : > { %v303_v56 = vsel %vm218_vm5, %v285_v10, %v4534_v51  ;;  %v4777_v12 = vpack.c.bf16 %v475_v34, %v468_v32  ;;  %v484_v7 = vand.u32 4294901760, %v483_v27  ;;  %v5881_v53 = vmov 0.0|0.0  }
  0xde   : > { %v477_v42 = vand.u32 4294901760, %v476_v38  ;;  %v489_v61 = vand.u32 4294901760, %v4765_v62  ;;  %v350_v23 = vand.u32 4294901760, %v303_v56  ;;  %3730 = vmatpush3.bf16.msra.mxu1 %v4752_v5  ;;  %3802 = vmatpush3.bf16.msra.mxu0 %v4752_v5  ;;  %v497_v22 = vsub.f32 %v4716_v46, %v496_v21 }
  0xdf   : > { %3731 = vmatprep.subr.bf16.mxu1 %v5881_v53  ;;  %3803 = vmatprep.subr.bf16.mxu0 %v5881_v53  ;;  %v5882_v4 = vand.u32 4294901760, %v4687_v44 }
  0xe0   : > { %v490_v50 = vsub.f32 %v4765_v62, %v489_v61  ;;  %v4788_v37 = vsub.f32 %v303_v56, %v350_v23  ;;  %v4790_v32 = vpack.c.bf16 %v477_v42, %v470_v13  ;;  %v4792_v34 = vpack.c.bf16 %v489_v61, %v482_v6 }
  0xe1   : > { %v4801_v2 = vpack.c.bf16 %v350_v23, %v5882_v4  ;;  %v498_v61 = vand.u32 4294901760, %v497_v22  ;;  %v1801_v23 = vsel %vm1796_vm3, %v4513_v35, 1e+30 }
  0xe2   : > { %v491_v38 = vand.u32 4294901760, %v490_v50  ;;  %v503_v10 = vand.u32 4294901760, %v4788_v37  ;;  %v3783_v27 = vpack.c.bf16 %v4788_v37, %v4716_v46  ;;  %3733 = vmatpush3.bf16.msra.mxu1 %v4775_v19  ;;  %3805 = vmatpush3.bf16.msra.mxu0 %v4775_v19  ;;  %v1802_v4 = vsel %vm178_vm1, %v1801_v23, inf }
  0xe3   : > { %3734 = vmatprep.subr.bf16.mxu1 %v5881_v53  ;;  %3806 = vmatprep.subr.bf16.mxu0 %v5881_v53  ;;  %v988_v50 = vstv %s2753_s30 }
  0xe4   : > { %v504_v6 = vsub.f32 %v4788_v37, %v503_v10  ;;  %v4806_v42 = vpack.c.bf16 %v491_v38, %v484_v7  ;;  %v4808_v13 = vpack.c.bf16 %v503_v10, %v496_v21  ;;  %v986_v21 = vstv %s2752_s29  ;;  %s4316_s29 = scalar_lea.vmem %s4315_s28, 32 }
  0xe5   : > { %v987_v7 = vmul.f32 %v986_v21, %v4500_v24  ;;  %p4318_p0 = scmp.lt.s32.totalorder %s4316_s29, %s4310_s26 }
  0xe6   : > { %v505_v56 = vand.u32 4294901760, %v504_v6  ;;  %3736 = vmatpush3.bf16.msra.mxu1 %v4801_v2  ;;  %3808 = vmatpush3.bf16.msra.mxu0 %v4801_v2 }
  0xe7   : > { %3809 = vmatprep.subr.bf16.mxu0 %v5881_v53  ;;  %3737 = vmatprep.subr.bf16.mxu1 %v5881_v53  ;;  %v989_v22 = vadd.f32 %v988_v50, %v987_v7  ;;  %p4319_p1 = por %p4318_p0, %p4317_p13 }
  0xe8   : > { %v4817_v44 = vpack.c.bf16 %v505_v56, %v498_v61 }
  0xe9   : > { %v1006_v38 = vrot.slane %v989_v22, %v4480_v9  ;;  %vm999_vm8 = vcmp.ge.f32.partialorder %v989_v22, 0.0  ;;  %p4320_p2 = pnand %p4319_p1, %p4313_p12 }
  0xee   : > { %1803 = vmin.xlane.f32.xlu1 %v1802_v4 }
  0xff   : > { %1037 = vbcast.lane.b32.xlu1 %v4524_v45, 264 }
 0x103   : > { %1041 = vbcast.lane.b32.xlu1 %v4524_v45, 272 }
 0x107   : > { %1852 = vbcast.lane.b32.xlu1 %v4528_v49, 256 }
 0x10b   : > { %1049 = vbcast.lane.b32.xlu1 %v4524_v45, 288 }
 0x10d   : > { %v994_v10 = vpop.xlane.xlu1 %993  ;;  %v998_v61 = vpop.xlane.xlu0 %997 }
 0x10e   : > { %v1000_v6 = vmul.f32 %v994_v10, %v989_v22  ;;  %v1001_v56 = vmul.f32 %v998_v61, %v989_v22 }
 0x10f   : > { %1008 = vbcast.lane.b32.xlu1 %v1006_v38, 256 }
 0x110   : > { %v1002_v23 = vsel %vm999_vm8, %v1000_v6, %v1001_v56  ;;  %v5883_v6 = vmov 0.0  }
 0x111   : > { %v1018_v4 = vrot.slane %v1002_v23, %v4480_v9  ;;  %v1800_v56 = vpop.xlane.xlu0 %1799  ;;  %152 = vst [vmem:[%s5731_s7] sm:$0x1] %v5883_v6 }
 0x113   : > { %1020 = vbcast.lane.b32.xlu0 %v1018_v4, 256  ;;  %1860 = vbcast.lane.b32.xlu1 %v4528_v49, 272 }
 0x117   : > { %1057 = vbcast.lane.b32.xlu1 %v4524_v45, 304  ;;  %1085 = vbcast.lane.b32.xlu0 %v4524_v45, 360 }
 0x11b   : > { %1868 = vbcast.lane.b32.xlu1 %v4528_v49, 288 }
 0x11f   : > { %1065 = vbcast.lane.b32.xlu1 %v4524_v45, 320 }
 0x123   : > { %1814 = vbcast.lane.b32.xlu1 %v4590_v25, 256 }
 0x127   : > { %1876 = vbcast.lane.b32.xlu1 %v4528_v49, 304 }
 0x12b   : > { %1073 = vbcast.lane.b32.xlu1 %v4524_v45, 336 }
 0x12f   : > { %1884 = vbcast.lane.b32.xlu1 %v4528_v49, 320 }
 0x13c   : > { %v208_v24 = vpop.permute.xlu1 %207 }
 0x13d   : > { %v209_v21 = vsub.f32 %v4604_v36, %v208_v24 }
 0x13f   : > { %v212_v7 = vsel %vm176_vm0, %v209_v21, -1e+30 }
 0x140   : > { %v213_v50 = vmul.f32 1.442695, %v212_v7 }
 0x142   : > { %4279 = vpow2.f32 %v213_v50 }
 0x14c   : > { %v4280_v22 = vpop.eup %4279 }
 0x14d   : > { %v4839_v38 = vand.u32 4294901760, %v4280_v22 }
 0x14f   : > { %v4842_v10 = vsub.f32 %v4280_v22, %v4839_v38  ;;  %v5887_v22 = vpack.c.bf16 %v4690_v48, %v4616_v47 }
 0x151   : > { %v387_v25 = vand.u32 4294901760, %v4842_v10 }
 0x153   : > { %3221 = vmatmul.mubr.f32.vlgmr.msra.gmra.mrb[0].mxu0 %v387_v25  ;;  %v388_v61 = vsub.f32 %v4842_v10, %v387_v25 }
 0x154   : > { %3811 = vmatpush3.bf16.msra.mxu0 %v4576_v16  ;;  %3255 = vmatprep.mubr.msk.f32.mxu0 %vm4381_vm7, %v5883_v6  ;;  %v1034_v16 = vpop.permute.xlu0 %1033 }
 0x155   : > { %3812 = vmatprep.subr.bf16.mxu0 %v5881_v53  ;;  %v389_v36 = vand.u32 4294901760, %v388_v61 }
 0x157   : > { %3116 = vmatmul.mubr.f32.vlgmr.msra.gmra.mrb[0].mxu1 %v389_v36 }
 0x158   : > { %3739 = vmatpush3.bf16.msra.mxu1 %v4592_v26  ;;  %3814 = vmatpush3.bf16.msra.mxu0 %v4703_v0  ;;  %v1046_v26 = vpop.permute.xlu0 %1045  ;;  %v4886_v0 = vsel %vm218_vm5, %v1034_v16, %v4534_v51 }
 0x159   : > { %3740 = vmatprep.subr.bf16.mxu1 %v5881_v53  ;;  %3815 = vmatprep.subr.bf16.mxu0 %v5881_v53 }
 0x15a   : > { %3150 = vmatprep.mubr.msk.f32.mxu1 %vm4381_vm7, %v5883_v6 }
 0x15c   : > { %3742 = vmatpush3.bf16.msra.mxu1 %v4722_v8  ;;  %3817 = vmatpush3.bf16.msra.mxu0 %v4611_v41  ;;  %v1857_v41 = vpop.permute.xlu0 %1856  ;;  %v1112_v8 = vand.u32 4294901760, %v4886_v0 }
 0x15d   : > { %3743 = vmatprep.subr.bf16.mxu1 %v5881_v53  ;;  %3818 = vmatprep.subr.bf16.mxu0 %v5881_v53 }
 0x160   : > { %3745 = vmatpush3.bf16.msra.mxu1 %v4619_v52  ;;  %3820 = vmatpush3.bf16.msra.mxu0 %v4731_v57  ;;  %v1054_v52 = vpop.permute.xlu0 %1053 }
 0x161   : > { %3746 = vmatprep.subr.bf16.mxu1 %v5881_v53  ;;  %3821 = vmatprep.subr.bf16.mxu0 %v5881_v53 }
 0x164   : > { %3748 = vmatpush3.bf16.msra.mxu1 %v4745_v17  ;;  %3823 = vmatpush3.bf16.msra.mxu0 %v4754_v58  ;;  %v1865_v57 = vpop.permute.xlu0 %1864  ;;  %v4901_v58 = vsel %vm218_vm5, %v1046_v26, %v4534_v51  ;;  %v1806_v17 = vmul.f32 %v1800_v56, %v4567_v11 }
 0x165   : > { %3749 = vmatprep.subr.bf16.mxu1 %v5881_v53  ;;  %3824 = vmatprep.subr.bf16.mxu0 %v5881_v53 }
 0x168   : > { %3751 = vmatpush3.bf16.msra.mxu1 %v4768_v54  ;;  %3826 = vmatpush3.bf16.msra.mxu0 %v4777_v12  ;;  %v5885_v12 = vpack.c.bf16 %v4573_v14, %v4659_v28  ;;  %v4937_v28 = vsel %vm218_vm5, %v1054_v52, %v4534_v51 }
 0x169   : > { %3752 = vmatprep.subr.bf16.mxu1 %v5881_v53  ;;  %3827 = vmatprep.subr.bf16.mxu0 %v5881_v53 }
 0x16c   : > { %3754 = vmatpush3.bf16.msra.mxu1 %v4790_v32  ;;  %3829 = vmatpush3.bf16.msra.mxu0 %v4792_v34  ;;  %v4925_v32 = vsel %vm218_vm5, %v1857_v41, %v4534_v51  ;;  %v1062_v34 = vpop.permute.xlu0 %1061 }
 0x16d   : > { %3755 = vmatprep.subr.bf16.mxu1 %v5881_v53  ;;  %3830 = vmatprep.subr.bf16.mxu0 %v5881_v53  ;;  %v1934_v23 = vand.u32 4294901760, %v4925_v32 }
 0x16f   : > { %v4969_v25 = vsub.f32 %v4925_v32, %v1934_v23 }
 0x170   : > { %3757 = vmatpush3.bf16.msra.mxu1 %v4806_v42  ;;  %3832 = vmatpush3.bf16.msra.mxu0 %v4808_v13  ;;  %v1873_v21 = vpop.permute.xlu0 %1872 }
 0x171   : > { %3758 = vmatprep.subr.bf16.mxu1 %v5881_v53  ;;  %3833 = vmatprep.subr.bf16.mxu0 %v5881_v53  ;;  %5888 = vst [vmem:[#allocation10_spill] sm:$0xff] %v4969_v25 }
 0x173   : > { %3256 = vmatmul.mubr.f32.vlgmr.msra.gmra.mrb[0].mxu0 %v4839_v38 }
 0x174   : > { %3760 = vmatpush3.bf16.msra.mxu1 %v4817_v44  ;;  %3835 = vmatpush3.bf16.msra.mxu0 %v4551_v3  ;;  %v5884_v3 = vpack.c.bf16 %v4549_v63, %v4541_v55  ;;  %v4912_v55 = vsub.f32 %v4886_v0, %v1112_v8  ;;  %v1121_v63 = vand.u32 4294901760, %v4901_v58  ;;  %v5886_v44 = vpack.c.bf16 %v4601_v33, %v4585_v20 }
 0x175   : > { %3761 = vmatprep.subr.bf16.mxu1 %v5881_v53  ;;  %3836 = vmatprep.subr.bf16.mxu0 %v5881_v53  ;;  %v1127_v20 = vand.u32 4294901760, %v4937_v28 }
 0x176   : > { %3290 = vmatprep.mubr.msk.f32.mxu0 %vm4381_vm7, %v5883_v6  ;;  %v4932_v14 = vsub.f32 %v4901_v58, %v1121_v63 }
 0x177   : > { %3151 = vmatmul.mubr.f32.vlgmr.msra.gmra.mrb[0].mxu1 %v4839_v38 }
 0x178   : > { %3763 = vmatpush3.bf16.msra.mxu1 %v5884_v3  ;;  %3838 = vmatpush3.bf16.msra.mxu0 %v4663_v29  ;;  %v5889_v3 = vpack.c.bf16 %v4720_v39, %v4633_v59  ;;  %v1070_v59 = vpop.permute.xlu0 %1069 }
 0x179   : > { %3764 = vmatprep.subr.bf16.mxu1 %v5881_v53  ;;  %3839 = vmatprep.subr.bf16.mxu0 %v5881_v53 }
 0x17a   : > { %3185 = vmatprep.mubr.msk.f32.mxu1 %vm4381_vm7, %v5883_v6 }
 0x17b   : > { %v1804_v54 = vpop.xlane.xlu1 %1803 }
 0x17c   : > { %v1807_v29 = vmul.f32 %v1804_v54, %v4567_v11  ;;  %3766 = vmatpush3.bf16.msra.mxu1 %v5885_v12  ;;  %3841 = vmatpush3.bf16.msra.mxu0 %v4674_v40  ;;  %v5821_v11 = vand.u32 4294901760, %v4912_v55  ;;  %v5008_v54 = vsel %vm218_vm5, %v1865_v57, %v4534_v51 }
 0x17d   : > { %3767 = vmatprep.subr.bf16.mxu1 %v5881_v53  ;;  %3842 = vmatprep.subr.bf16.mxu0 %v5881_v53 }
 0x17e   : > { %v1808_v42 = vsel %vm1805_vm9, %v1806_v17, %v1807_v29  ;;  %v1206_v33 = vsub.f32 %v4912_v55, %v5821_v11  ;;  %v5811_v17 = vand.u32 4294901760, %v4969_v25  ;;  %v5013_v29 = vsel %vm218_vm5, %v1062_v34, %v4534_v51 }
 0x17f   : > { %v1829_v13 = vrot.slane %v1808_v42, %v4480_v9  ;;  %v1038_v40 = vpop.permute.xlu1 %1037 }
 0x180   : > { %3769 = vmatpush3.bf16.msra.mxu1 %v5886_v44  ;;  %3844 = vmatpush3.bf16.msra.mxu0 %v4700_v60  ;;  %v4947_v4 = vsel %vm218_vm5, %v1038_v40, %v4534_v51  ;;  %v5817_v60 = vand.u32 4294901760, %v4932_v14  ;;  %v1207_v56 = vand.u32 4294901760, %v1206_v33  ;;  %v1940_v40 = vand.u32 4294901760, %v5008_v54 }
 0x181   : > { %1835 = vbcast.lane.b32.xlu0 %v1829_v13, 264  ;;  %1831 = vbcast.lane.b32.xlu1 %v1829_v13, 256  ;;  %v1115_v24 = vand.u32 4294901760, %v4947_v4 }
 0x182   : > { %3770 = vmatprep.subr.bf16.mxu1 %v5881_v53  ;;  %3845 = vmatprep.subr.bf16.mxu0 %v5881_v53  ;;  %v1227_v16 = vsub.f32 %v4932_v14, %v5817_v60 }
 0x183   : > { %v4960_v7 = vsub.f32 %v4947_v4, %v1115_v24  ;;  %v1042_v50 = vpop.permute.xlu1 %1041 }
 0x184   : > { %3772 = vmatpush3.bf16.msra.mxu1 %v5887_v22  ;;  %3847 = vmatpush3.bf16.msra.mxu0 %v4729_v31  ;;  %v4974_v61 = vsel %vm218_vm5, %v1042_v50, %v4534_v51  ;;  %v4987_v31 = vsub.f32 %v4937_v28, %v1127_v20  ;;  %v1228_v13 = vand.u32 4294901760, %v1227_v16  ;;  %v5891_v22 = vpack.c.bf16 %v4743_v18, %v4650_v15 }
 0x185   : > { %1896 = vbcast.lane.b32.xlu0 %v4528_v49, 344  ;;  %1081 = vbcast.lane.b32.xlu1 %v4524_v45, 352  ;;  %v5819_v36 = vand.u32 4294901760, %v4960_v7  ;;  %v1118_v48 = vand.u32 4294901760, %v4974_v61 }
 0x186   : > { %3773 = vmatprep.subr.bf16.mxu1 %v5881_v53  ;;  %3848 = vmatprep.subr.bf16.mxu0 %v5881_v53  ;;  %v5810_v34 = vand.u32 4294901760, %v4987_v31 }
 0x187   : > { %v1213_v26 = vsub.f32 %v4960_v7, %v5819_v36  ;;  %v4998_v41 = vsub.f32 %v4974_v61, %v1118_v48  ;;  %v1853_v52 = vpop.permute.xlu1 %1852 }
 0x188   : > { %3775 = vmatpush3.bf16.msra.mxu1 %v5889_v3  ;;  %3850 = vmatpush3.bf16.msra.mxu0 %v4752_v5  ;;  %v1914_v12 = vsel %vm218_vm5, %v1853_v52, %v4534_v51  ;;  %v2042_v3 = vsub.f32 %v4969_v25, %v5811_v17 }
 0x189   : > { %1093 = vbcast.lane.b32.xlu0 %v4524_v45, 376  ;;  %1892 = vbcast.lane.b32.xlu1 %v4528_v49, 336  ;;  %v1214_v39 = vand.u32 4294901760, %v1213_v26  ;;  %v5818_v5 = vand.u32 4294901760, %v4998_v41  ;;  %v1931_v42 = vand.u32 4294901760, %v1914_v12  ;;  %v1133_v26 = vand.u32 4294901760, %v5013_v29 }
 0x18a   : > { %3776 = vmatprep.subr.bf16.mxu1 %v5881_v53  ;;  %3851 = vmatprep.subr.bf16.mxu0 %v5881_v53 }
 0x18b   : > { %v1220_v44 = vsub.f32 %v4998_v41, %v5818_v5  ;;  %v5030_v33 = vsub.f32 %v1914_v12, %v1931_v42  ;;  %v1050_v50 = vpop.permute.xlu1 %1049  ;;  %v5042_v52 = vpack.c.bf16 %v1214_v39, %v1207_v56  ;;  %v1241_v56 = vsub.f32 %v4987_v31, %v5810_v34 }
 0x18c   : > { %3778 = vmatpush3.bf16.msra.mxu1 %v5891_v22  ;;  %3853 = vmatpush3.bf16.msra.mxu0 %v4775_v19  ;;  %v5040_v16 = vsel %vm218_vm5, %v1050_v50, %v4534_v51  ;;  %v5058_v12 = vpack.c.bf16 %v1934_v23, %v1931_v42  ;;  %v5065_v39 = vsub.f32 %v5008_v54, %v1940_v40  ;;  %v5072_v50 = vpop.permute.xlu0 %1818  ;;  %v2043_v34 = vand.u32 4294901760, %v2042_v3 }
 0x18d   : > { %5890 = vst [vmem:[#allocation11_spill] sm:$0xff] %v5030_v33  ;;  %1904 = vbcast.lane.b32.xlu0 %v4528_v49, 360  ;;  %1089 = vbcast.lane.b32.xlu1 %v4524_v45, 368  ;;  %v1221_v15 = vand.u32 4294901760, %v1220_v44  ;;  %v5812_v18 = vand.u32 4294901760, %v5030_v33  ;;  %v1124_v19 = vand.u32 4294901760, %v5040_v16  ;;  %v5062_v45 = vpack.c.bf16 %v4969_v25, %v5030_v33 }
 0x18e   : > { %3779 = vmatprep.subr.bf16.mxu1 %v5881_v53  ;;  %3854 = vmatprep.subr.bf16.mxu0 %v5881_v53  ;;  %5892 = vst [vmem:[#allocation12_spill] sm:$0xff] %v5058_v12  ;;  %5893 = vst [vmem:[#allocation13_spill] sm:$0xff] %v5065_v39  ;;  %v5070_v44 = vsel %vm218_vm5, %v1873_v21, %v4534_v51  ;;  %v5894_v54 = vpack.c.bf16 %v4765_v62, %v4682_v43  ;;  %v5814_v3 = vand.u32 4294901760, %v5065_v39 }
 0x18f   : > { %v5077_v32 = vsub.f32 %v5040_v16, %v1124_v19  ;;  %v5079_v23 = vpop.permute.xlu1 %1008  ;;  %v5081_v42 = vpack.c.bf16 %v1228_v13, %v1221_v15  ;;  %v5090_v21 = vsub.f32 %v5013_v29, %v1133_v26  ;;  %v2035_v22 = vsub.f32 %v5030_v33, %v5812_v18 }
 0x190   : > { %3781 = vmatpush3.bf16.msra.mxu1 %v5894_v54  ;;  %3856 = vmatpush3.bf16.msra.mxu0 %v4801_v2  ;;  %v1946_v2 = vand.u32 4294901760, %v5070_v44  ;;  %v1242_v15 = vand.u32 4294901760, %v1241_v56  ;;  %v5108_v54 = vsel %vm218_vm5, %v1070_v59, %v4534_v51  ;;  %v1881_v46 = vpop.permute.xlu0 %1880 }
 0x191   : > { %1912 = vbcast.lane.b32.xlu0 %v4528_v49, 376  ;;  %1900 = vbcast.lane.b32.xlu1 %v4528_v49, 352  ;;  %v5815_v13 = vand.u32 4294901760, %v5077_v32  ;;  %v2036_v62 = vand.u32 4294901760, %v2035_v22  ;;  %v5813_v22 = vand.u32 4294901760, %v5090_v21 }
 0x192   : > { %3782 = vmatprep.subr.bf16.mxu1 %v5881_v53  ;;  %4002 = vmatprep.subr.bf16.mxu0 %v5058_v12  ;;  %v5132_v0 = vsub.f32 %v5070_v44, %v1946_v2 }
 0x193   : > { %3291 = vmatmul.mubr.f32.vlgmr.msra.gmra.mrb[0].mxu0 %v4839_v38  ;;  %v1234_v17 = vsub.f32 %v5077_v32, %v5815_v13  ;;  %v1861_v18 = vpop.permute.xlu1 %1860  ;;  %v5121_v38 = vpack.c.bf16 %v1115_v24, %v1112_v8  ;;  %v5127_v56 = vpack.c.bf16 %v2043_v34, %v2036_v62  ;;  %v1139_v8 = vand.u32 4294901760, %v5108_v54 }
 0x194   : > { %3784 = vmatpush3.bf16.msra.mxu1 %v3783_v27  ;;  %v1916_v59 = vsel %vm218_vm5, %v1861_v18, %v4534_v51  ;;  %4004 = vmatpush3.bf16.msra.mxu0 %v5058_v12  ;;  %5895 = vst [vmem:[#allocation14_spill] sm:$0xff] %v5132_v0 }
 0x195   : > { %1908 = vbcast.lane.b32.xlu1 %v4528_v49, 368  ;;  %v1235_v37 = vand.u32 4294901760, %v1234_v17  ;;  %3857 = vmatprep.subr.bf16.mxu1 %v5881_v53  ;;  %v1937_v27 = vand.u32 4294901760, %v1916_v59  ;;  %v2056_v49 = vsub.f32 %v5065_v39, %v5814_v3  ;;  %v1255_v17 = vsub.f32 %v5090_v21, %v5813_v22 }
 0x196   : > { %v5171_v61 = vsub.f32 %v5108_v54, %v1139_v8  ;;  %v5188_v3 = vpack.c.bf16 %v1127_v20, %v1124_v19 }
 0x197   : > { %3186 = vmatmul.mubr.f32.vlgmr.msra.gmra.mrb[0].mxu1 %v4842_v10  ;;  %v5136_v4 = vpack.c.bf16 %v1940_v40, %v1937_v27  ;;  %v5138_v24 = vsub.f32 %v1916_v59, %v1937_v27  ;;  %v1058_v34 = vpop.permute.xlu1 %1057  ;;  %v5140_v18 = vpack.c.bf16 %v1242_v15, %v1235_v37  ;;  %v5152_v10 = vpack.c.bf16 %v1121_v63, %v1118_v48  ;;  %v1078_v15 = vpop.permute.xlu0 %1077 }
 0x198   : > { %3859 = vmatpush3.bf16.msra.mxu1 %v5121_v38  ;;  %v1101_v40 = vsel %vm218_vm5, %v1058_v34, %v4534_v51  ;;  %3325 = vmatprep.mubr.msk.f32.mxu1 %vm4381_vm7, %v5883_v6  ;;  %v5820_v63 = vand.u32 4294901760, %v5132_v0  ;;  %v5177_v48 = vsel %vm218_vm5, %v1881_v46, %v4534_v51  ;;  %v2057_v34 = vand.u32 4294901760, %v2056_v49  ;;  %5899 = vst [vmem:[#allocation18_spill] sm:$0xff] %v5188_v3 }
 0x199   : > { %5896 = vst [vmem:[#allocation15_spill] sm:$0xff] %v5136_v4  ;;  %5897 = vst [vmem:[#allocation16_spill] sm:$0xff] %v5138_v24  ;;  %3860 = vmatprep.subr.bf16.mxu1 %v5881_v53  ;;  %v5816_v44 = vand.u32 4294901760, %v5138_v24  ;;  %v1130_v62 = vand.u32 4294901760, %v1101_v40  ;;  %4006 = vmatprep.subr.bf16.mxu0 %v5136_v4  ;;  %v5165_v58 = vpack.c.bf16 %v5065_v39, %v5138_v24  ;;  %v1256_v22 = vand.u32 4294901760, %v1255_v17 }
 0x19a   : > { %5898 = vst [vmem:[#allocation17_spill] sm:$0xff] %v5152_v10  ;;  %4008 = vmatpush3.bf16.msra.mxu0 %v5136_v4  ;;  %v5823_v16 = vand.u32 4294901760, %v5171_v61  ;;  %v1952_v28 = vand.u32 4294901760, %v5177_v48  ;;  %v1106_v20 = vsel %vm218_vm5, %v1078_v15, %v4534_v51  ;;  %v2070_v19 = vsub.f32 %v5132_v0, %v5820_v63 }
 0x19b   : > { %v5179_v59 = vsub.f32 %v1101_v40, %v1130_v62  ;;  %v1869_v37 = vpop.permute.xlu1 %1868  ;;  %v2049_v27 = vsub.f32 %v5138_v24, %v5816_v44  ;;  %v5217_v36 = vpack.c.bf16 %v1133_v26, %v1130_v62  ;;  %v1889_v63 = vpop.permute.xlu0 %1888 }
 0x19c   : > { %3862 = vmatpush3.bf16.msra.mxu1 %v5152_v10  ;;  %v1918_v46 = vsel %vm218_vm5, %v1869_v37, %v4534_v51  ;;  %v1269_v26 = vsub.f32 %v5171_v61, %v5823_v16  ;;  %v5234_v62 = vsub.f32 %v5177_v48, %v1952_v28  ;;  %v2071_v16 = vand.u32 4294901760, %v2070_v19 }
 0x19d   : > { %v5822_v40 = vand.u32 4294901760, %v5179_v59  ;;  %3863 = vmatprep.subr.bf16.mxu1 %v5881_v53  ;;  %v1943_v49 = vand.u32 4294901760, %v1918_v46  ;;  %v2050_v17 = vand.u32 4294901760, %v2049_v27  ;;  %5902 = vst [vmem:[#allocation21_spill] sm:$0xff] %v5217_v36 }
 0x19e   : > { %5903 = vst [vmem:[#allocation22_spill] sm:$0xff] %v5234_v62  ;;  %v1270_v43 = vand.u32 4294901760, %v1269_v26  ;;  %v5826_v19 = vand.u32 4294901760, %v5234_v62 }
 0x19f   : > { %v1248_v37 = vsub.f32 %v5179_v59, %v5822_v40  ;;  %v5209_v44 = vpack.c.bf16 %v1946_v2, %v1943_v49  ;;  %v5211_v60 = vsub.f32 %v1918_v46, %v1943_v49  ;;  %v1066_v27 = vpop.permute.xlu1 %1065  ;;  %v5213_v5 = vpack.c.bf16 %v2057_v34, %v2050_v17 }
 0x1a0   : > { %3865 = vmatpush3.bf16.msra.mxu1 %v5188_v3  ;;  %v1103_v15 = vsel %vm218_vm5, %v1066_v27, %v4534_v51  ;;  %v1145_v34 = vand.u32 4294901760, %v1106_v20  ;;  %v1923_v46 = vsel %vm218_vm5, %v1889_v63, %v4534_v51 }
 0x1a1   : > { %5900 = vst [vmem:[#allocation19_spill] sm:$0xff] %v5209_v44  ;;  %5901 = vst [vmem:[#allocation20_spill] sm:$0xff] %v5211_v60  ;;  %v1249_v11 = vand.u32 4294901760, %v1248_v37  ;;  %v5824_v2 = vand.u32 4294901760, %v5211_v60  ;;  %v1136_v40 = vand.u32 4294901760, %v1103_v15  ;;  %3866 = vmatprep.subr.bf16.mxu1 %v5881_v53  ;;  %4010 = vmatprep.subr.bf16.mxu0 %v5209_v44  ;;  %v5228_v29 = vpack.c.bf16 %v5132_v0, %v5211_v60 }
 0x1a2   : > { %4012 = vmatpush3.bf16.msra.mxu0 %v5209_v44  ;;  %v1958_v13 = vand.u32 4294901760, %v1923_v46 }
 0x1a3   : > { %v5240_v49 = vsub.f32 %v1103_v15, %v1136_v40  ;;  %v5242_v17 = vpop.permute.xlu1 %1814  ;;  %v5244_v37 = vpack.c.bf16 %v1256_v22, %v1249_v11  ;;  %v2063_v27 = vsub.f32 %v5211_v60, %v5824_v2  ;;  %v5251_v48 = vpack.c.bf16 %v1139_v8, %v1136_v40 }
 0x1a4   : > { %3868 = vmatpush3.bf16.msra.mxu1 %v5217_v36  ;;  %v5258_v22 = vsub.f32 %v1106_v20, %v1145_v34  ;;  %v5272_v15 = vsub.f32 %v1923_v46, %v1958_v13 }
 0x1a5   : > { %5904 = vst [vmem:[#allocation23_spill] sm:$0xff] %v5251_v48  ;;  %v5825_v63 = vand.u32 4294901760, %v5240_v49  ;;  %3869 = vmatprep.subr.bf16.mxu1 %v5881_v53  ;;  %v2064_v11 = vand.u32 4294901760, %v2063_v27 }
 0x1a6   : > { %5905 = vst [vmem:[#allocation24_spill] sm:$0xff] %v5272_v15 }
 0x1a7   : > { %v1262_v54 = vsub.f32 %v5240_v49, %v5825_v63  ;;  %v1877_v8 = vpop.permute.xlu1 %1876  ;;  %v5264_v40 = vpack.c.bf16 %v2071_v16, %v2064_v11 }
 0x1a8   : > { %v1920_v2 = vsel %vm218_vm5, %v1877_v8, %v4534_v51  ;;  %3871 = vmatpush3.bf16.msra.mxu1 %v5251_v48  ;;  %v2084_v8 = vsub.f32 %v5234_v62, %v5826_v19 }
 0x1a9   : > { %v1263_v27 = vand.u32 4294901760, %v1262_v54  ;;  %v1949_v20 = vand.u32 4294901760, %v1920_v2  ;;  %3872 = vmatprep.subr.bf16.mxu1 %v5881_v53 }
 0x1aa   : > { %v2085_v0 = vand.u32 4294901760, %v2084_v8 }
 0x1ab   : > { %v5274_v57 = vpack.c.bf16 %v1952_v28, %v1949_v20  ;;  %v5276_v63 = vsub.f32 %v1920_v2, %v1949_v20  ;;  %v1074_v16 = vpop.permute.xlu1 %1073  ;;  %v5278_v11 = vpack.c.bf16 %v1270_v43, %v1263_v27  ;;  %v5908_v43 = vand.u32 4294901760, %v5258_v22 }
 0x1ac   : > { %v1105_v54 = vsel %vm218_vm5, %v1074_v16, %v4534_v51 }
 0x1ad   : > { %5906 = vst [vmem:[#allocation25_spill] sm:$0xff] %v5274_v57  ;;  %5907 = vst [vmem:[#allocation26_spill] sm:$0xff] %v5276_v63  ;;  %v5830_v47 = vand.u32 4294901760, %v5276_v63  ;;  %v1142_v26 = vand.u32 4294901760, %v1105_v54  ;;  %4014 = vmatprep.subr.bf16.mxu0 %v5274_v57  ;;  %v5290_v28 = vpack.c.bf16 %v5234_v62, %v5276_v63  ;;  %v1283_v2 = vsub.f32 %v5258_v22, %v5908_v43 }
 0x1ae   : > { %4016 = vmatpush3.bf16.msra.mxu0 %v5274_v57 }
 0x1af   : > { %v5297_v27 = vpack.c.bf16 %v1145_v34, %v1142_v26  ;;  %v5299_v20 = vsub.f32 %v1105_v54, %v1142_v26  ;;  %v1885_v16 = vpop.permute.xlu1 %1884  ;;  %v2077_v19 = vsub.f32 %v5276_v63, %v5830_v47  ;;  %v1284_v26 = vand.u32 4294901760, %v1283_v2 }
 0x1b0   : > { %v1922_v62 = vsel %vm218_vm5, %v1885_v16, %v4534_v51  ;;  %v5910_v54 = vand.u32 4294901760, %v5272_v15 }
 0x1b1   : > { %5909 = vst [vmem:[#allocation27_spill] sm:$0xff] %v5297_v27  ;;  %v5833_v43 = vand.u32 4294901760, %v5299_v20  ;;  %v1955_v60 = vand.u32 4294901760, %v1922_v62  ;;  %3874 = vmatpush3.bf16.msra.mxu1 %v5297_v27  ;;  %v2078_v34 = vand.u32 4294901760, %v2077_v19 }
 0x1b2   : > { %3875 = vmatprep.subr.bf16.mxu1 %v5881_v53  ;;  %v2098_v8 = vsub.f32 %v5272_v15, %v5910_v54 }
 0x1b3   : > { %v1276_v16 = vsub.f32 %v5299_v20, %v5833_v43  ;;  %v5318_v47 = vpack.c.bf16 %v1958_v13, %v1955_v60  ;;  %v5320_v63 = vsub.f32 %v1922_v62, %v1955_v60  ;;  %v5322_v46 = vpack.c.bf16 %v2085_v0, %v2078_v34  ;;  %v1021_v43 = vpop.permute.xlu0 %1020 }
 0x1b4   : > { %v2099_v13 = vand.u32 4294901760, %v2098_v8  ;;  %v1013_v34 = vrot.slane %v4504_v30, %v4480_v9 }
 0x1b5   : > { %5911 = vst [vmem:[#allocation28_spill] sm:$0xff] %v5318_v47  ;;  %5912 = vst [vmem:[#allocation29_spill] sm:$0xff] %v5320_v63  ;;  %v1277_v39 = vand.u32 4294901760, %v1276_v16  ;;  %v5836_v19 = vand.u32 4294901760, %v5320_v63  ;;  %4018 = vmatprep.subr.bf16.mxu0 %v5318_v47  ;;  %v5328_v2 = vpack.c.bf16 %v5272_v15, %v5320_v63 }
 0x1b6   : > { %4020 = vmatpush3.bf16.msra.mxu0 %v5318_v47  ;;  %v1014_v16 = vmul.f32 %v1013_v34, %v5079_v23 }
 0x1b7   : > { %v5331_v54 = vpack.c.bf16 %v1284_v26, %v1277_v39  ;;  %v2091_v60 = vsub.f32 %v5320_v63, %v5836_v19  ;;  %v1086_v26 = vpop.permute.xlu0 %1085  ;;  %v1823_v19 = vrot.slane %v4513_v35, %v4480_v9 }
 0x1b8   : > { %v1022_v15 = vsub.f32 %v1014_v16, %v1021_v43 }
 0x1b9   : > { %v2092_v0 = vand.u32 4294901760, %v2091_v60  ;;  %v1825_v60 = vmul.f32 %v1823_v19, %v5072_v50 }
 0x1ba   : > { %v1025_v24 = vsel %vm990_vm2, %v1022_v15, -1e+30 }
 0x1bb   : > { %v5336_v62 = vpack.c.bf16 %v2099_v13, %v2092_v0  ;;  %v1026_v39 = vmul.f32 1.442695, %v1025_v24  ;;  %v1824_v13 = vmul.f32 %v1823_v19, %v5242_v17  ;;  %v5352_v24 = vsel %vm218_vm5, %v1086_v26, %v4534_v51 }
 0x1bc   : > { %v5838_v16 = vand.u32 4294901760, %v5352_v24 }
 0x1bd   : > { %4281 = vpow2.f32 %v1026_v39 }
 0x1c7   : > { %v4282_v8 = vpop.eup %4281 }
 0x1c8   : > { %v5347_v34 = vand.u32 4294901760, %v4282_v8 }
 0x1ca   : > { %v5366_v26 = vsub.f32 %v4282_v8, %v5347_v34 }
 0x1f3   : > { %v1832_v0 = vpop.permute.xlu1 %1831  ;;  %v1836_v30 = vpop.permute.xlu0 %1835 }
 0x1f4   : > { %v1837_v63 = vsub.f32 %v1824_v13, %v1832_v0  ;;  %v1838_v23 = vsub.f32 %v1825_v60, %v1836_v30 }
 0x1f6   : > { %v1841_v15 = vsel %vm1796_vm3, %v1837_v63, -1e+30  ;;  %v1842_v9 = vsel %vm1796_vm3, %v1838_v23, -1e+30 }
 0x1f7   : > { %v1843_v35 = vmul.f32 1.442695, %v1841_v15  ;;  %v1845_v50 = vmul.f32 1.442695, %v1842_v9  ;;  %v1082_v17 = vpop.permute.xlu1 %1081  ;;  %v1897_v43 = vpop.permute.xlu0 %1896  ;;  %v5850_v15 = vand.u32 4294901760, %v5366_v26 }
 0x1f8   : > { %v5361_v19 = vsel %vm218_vm5, %v1082_v17, %v4534_v51  ;;  %v1925_v63 = vsel %vm218_vm5, %v1897_v43, %v4534_v51 }
 0x1f9   : > { %4283 = vpow2.f32 %v1843_v35  ;;  %v5839_v39 = vand.u32 4294901760, %v5361_v19  ;;  %v1964_v23 = vand.u32 4294901760, %v1925_v63 }
 0x1fa   : > { %4285 = vpow2.f32 %v1845_v50 }
 0x1fb   : > { %v5375_v60 = vpack.c.bf16 %v5838_v16, %v5839_v39  ;;  %v1893_v13 = vpop.permute.xlu1 %1892  ;;  %v1094_v0 = vpop.permute.xlu0 %1093  ;;  %v1195_v39 = vsub.f32 %v5366_v26, %v5850_v15  ;;  %v5420_v12 = vsub.f32 %v1925_v63, %v1964_v23 }
 0x1fc   : > { %v1924_v30 = vsel %vm218_vm5, %v1893_v13, %v4534_v51  ;;  %v1110_v9 = vsel %vm218_vm5, %v1094_v0, %v4534_v51 }
 0x1fd   : > { %5913 = vst [vmem:[#allocation30_spill] sm:$0xff] %v5375_v60  ;;  %v1961_v8 = vand.u32 4294901760, %v1924_v30  ;;  %3877 = vmatpush3.bf16.msra.mxu1 %v5375_v60  ;;  %v1157_v13 = vand.u32 4294901760, %v1110_v9  ;;  %v1196_v44 = vand.u32 4294901760, %v1195_v39 }
 0x1fe   : > { %3878 = vmatprep.subr.bf16.mxu1 %v5881_v53 }
 0x1ff   : > { %v5386_v35 = vpack.c.bf16 %v1964_v23, %v1961_v8  ;;  %v1090_v50 = vpop.permute.xlu1 %1089  ;;  %v1905_v17 = vpop.permute.xlu0 %1904 }
 0x200   : > { %v1109_v43 = vsel %vm218_vm5, %v1090_v50, %v4534_v51  ;;  %v1927_v0 = vsel %vm218_vm5, %v1905_v17, %v4534_v51  ;;  %v5411_v17 = vsub.f32 %v1924_v30, %v1961_v8  ;;  %v5425_v30 = vsub.f32 %v1110_v9, %v1157_v13 }
 0x201   : > { %5914 = vst [vmem:[#allocation31_spill] sm:$0xff] %v5386_v35  ;;  %v1154_v16 = vand.u32 4294901760, %v1109_v43  ;;  %4022 = vmatprep.subr.bf16.mxu0 %v5386_v35 }
 0x202   : > { %4024 = vmatpush3.bf16.msra.mxu0 %v5386_v35  ;;  %v1970_v35 = vand.u32 4294901760, %v1927_v0 }
 0x203   : > { %v4284_v25 = vpop.eup %4283  ;;  %v5399_v33 = vpack.c.bf16 %v1157_v13, %v1154_v16  ;;  %v1901_v60 = vpop.permute.xlu1 %1900  ;;  %v5414_v36 = vsub.f32 %v1109_v43, %v1154_v16  ;;  %v2111_v13 = vand.u32 4294901760, %v5420_v12 }
 0x204   : > { %v1913_v47 = vpop.permute.xlu0 %1912  ;;  %v4286_v50 = vpop.eup %4285  ;;  %v5401_v27 = vand.u32 4294901760, %v4284_v25  ;;  %v1926_v57 = vsel %vm218_vm5, %v1901_v60, %v4534_v51  ;;  %v5434_v43 = vsub.f32 %v1927_v0, %v1970_v35  ;;  %v1310_v0 = vand.u32 4294901760, %v5425_v30 }
 0x205   : > { %5915 = vst [vmem:[#allocation32_spill] sm:$0xff] %v5399_v33  ;;  %v1929_v15 = vsel %vm218_vm5, %v1913_v47, %v4534_v51  ;;  %v5409_v48 = vand.u32 4294901760, %v4286_v50  ;;  %3880 = vmatpush3.bf16.msra.mxu1 %v5399_v33  ;;  %v1967_v4 = vand.u32 4294901760, %v1926_v57  ;;  %v5919_v33 = vand.u32 4294901760, %v5352_v24 }
 0x206   : > { %v1976_v3 = vand.u32 4294901760, %v1929_v15  ;;  %3881 = vmatprep.subr.bf16.mxu1 %v5881_v53  ;;  %v5418_v60 = vsub.f32 %v4284_v25, %v5401_v27 }
 0x207   : > { %v1909_v47 = vpop.permute.xlu1 %1908  ;;  %v5423_v10 = vsub.f32 %v4286_v50, %v5409_v48  ;;  %v5427_v8 = vpack.c.bf16 %v1970_v35, %v1967_v4  ;;  %v5429_v39 = vsub.f32 %v1926_v57, %v1967_v4  ;;  %v2104_v57 = vand.u32 4294901760, %v5411_v17 }
 0x208   : > { %v1928_v16 = vsel %vm218_vm5, %v1909_v47, %v4534_v51  ;;  %3326 = vmatmul.mubr.f32.vlgmr.msra.gmra.mrb[2].mxu1 %v1196_v44  ;;  %v5867_v63 = vand.u32 4294901760, %v5418_v60  ;;  %v1303_v4 = vand.u32 4294901760, %v5414_v36  ;;  %v5443_v9 = vsub.f32 %v1929_v15, %v1976_v3 }
 0x209   : > { %5916 = vst [vmem:[#allocation33_spill] sm:$0xff] %v5427_v8  ;;  %v1973_v25 = vand.u32 4294901760, %v1928_v16  ;;  %3883 = vmatpush3.bf16.msra.mxu1 %v5042_v52  ;;  %v5868_v23 = vand.u32 4294901760, %v5423_v10  ;;  %3360 = vmatprep.mubr.msk.f32.mxu1 %vm4381_vm7, %v5883_v6  ;;  %v2118_v51 = vand.u32 4294901760, %v5429_v39  ;;  %v2125_v50 = vand.u32 4294901760, %v5434_v43 }
 0x20a   : > { %4026 = vmatprep.subr.bf16.mxu0 %v5427_v8  ;;  %3884 = vmatprep.subr.bf16.mxu1 %v5881_v53  ;;  %v2014_v35 = vsub.f32 %v5418_v60, %v5867_v63  ;;  %v5918_v63 = vand.u32 4294901760, %v5361_v19  ;;  %v5475_v1 = vpack.c.bf16 %v1310_v0, %v1303_v4 }
 0x20b   : > { %v5448_v52 = vpack.c.bf16 %v1976_v3, %v1973_v25  ;;  %v5450_v44 = vsub.f32 %v1928_v16, %v1973_v25  ;;  %4028 = vmatpush3.bf16.msra.mxu0 %v5427_v8  ;;  %v2024_v15 = vsub.f32 %v5423_v10, %v5868_v23  ;;  %v2139_v16 = vand.u32 4294901760, %v5443_v9 }
 0x20c   : > { %v2015_v47 = vand.u32 4294901760, %v2014_v35  ;;  %v5467_v25 = vpack.c.bf16 %v2111_v13, %v2104_v57  ;;  %v5472_v23 = vsub.f32 %v5361_v19, %v5918_v63 }
 0x20d   : > { %v2132_v3 = vand.u32 4294901760, %v5450_v44  ;;  %3886 = vmatpush3.bf16.msra.mxu1 %v5081_v42  ;;  %4030 = vmatprep.subr.bf16.mxu0 %v5448_v52  ;;  %v5477_v42 = vpack.c.bf16 %v2125_v50, %v2118_v51  ;;  %v2025_v35 = vand.u32 4294901760, %v2024_v15 }
 0x20e   : > { %3887 = vmatprep.subr.bf16.mxu1 %v5881_v53  ;;  %5917 = vst [vmem:[#allocation34_spill] sm:$0xff] %v5467_v25  ;;  %3535 = vmatprep.mubr.f32.mxu0 %v2015_v47  ;;  %v5485_v25 = vsub.f32 %v5352_v24, %v5919_v33  ;;  %v1289_v19 = vand.u32 4294901760, %v5472_v23  ;;  %v1304_v24 = vsub.f32 %v5414_v36, %v1303_v4 }
 0x20f   : > { %4032 = vmatpush3.bf16.msra.mxu0 %v5448_v52  ;;  %v5480_v8 = vpack.c.bf16 %v2139_v16, %v2132_v3  ;;  %v1311_v47 = vsub.f32 %v5425_v30, %v1310_v0  ;;  %v2133_v0 = vsub.f32 %v5450_v44, %v2132_v3  ;;  %v5920_v3 = vpack.c.bf16 %v4960_v7, %v4912_v55 }
 0x210   : > { %4034 = vmatprep.subr.bf16.mxu0 %v5127_v56  ;;  %v1296_v63 = vand.u32 4294901760, %v5485_v25  ;;  %v1290_v33 = vsub.f32 %v5472_v23, %v1289_v19 }
 0x211   : > { %3889 = vmatpush3.bf16.msra.mxu1 %v5140_v18  ;;  %v2105_v18 = vsub.f32 %v5411_v17, %v2104_v57  ;;  %v1305_v57 = vand.u32 4294901760, %v1304_v24 }
 0x212   : > { %3536 = vmatmul.mubr.f32.vlgmr.msra.gmra.mrb[2].mxu0 %v2025_v35  ;;  %3890 = vmatprep.subr.bf16.mxu1 %v5881_v53  ;;  %v2119_v35 = vsub.f32 %v5429_v39, %v2118_v51 }
 0x213   : > { %4036 = vmatpush3.bf16.msra.mxu0 %v5127_v56  ;;  %3570 = vmatprep.mubr.f32.mxu0 %v5401_v27  ;;  %v1297_v56 = vsub.f32 %v5485_v25, %v1296_v63 }
 0x214   : > { %4038 = vmatprep.subr.bf16.mxu0 %v5213_v5 }
 0x215   : > { %3892 = vmatpush3.bf16.msra.mxu1 %v5244_v37  ;;  %v1291_v37 = vand.u32 4294901760, %v1290_v33  ;;  %v1298_v15 = vand.u32 4294901760, %v1297_v56  ;;  %v2126_v33 = vsub.f32 %v5434_v43, %v2125_v50  ;;  %v2134_v50 = vand.u32 4294901760, %v2133_v0 }
 0x216   : > { %3893 = vmatprep.subr.bf16.mxu1 %v5881_v53  ;;  %v5941_v0 = vand.u32 4294901760, %v4960_v7  ;;  %v5945_v7 = vand.u32 4294901760, %v4932_v14 }
 0x217   : > { %4040 = vmatpush3.bf16.msra.mxu0 %v5213_v5  ;;  %v2112_v5 = vsub.f32 %v5420_v12, %v2111_v13  ;;  %v3900_v4 = vpack.c.bf16 %v1298_v15, %v1291_v37  ;;  %v1312_v13 = vand.u32 4294901760, %v1311_v47  ;;  %v5923_v15 = vpack.c.bf16 %v5090_v21, %v5179_v59 }
 0x218   : > { %4042 = vmatprep.subr.bf16.mxu0 %v5264_v40  ;;  %v5924_v47 = vpack.c.bf16 %v5171_v61, %v5240_v49 }
 0x219   : > { %3895 = vmatpush3.bf16.msra.mxu1 %v5278_v11  ;;  %v2106_v11 = vand.u32 4294901760, %v2105_v18  ;;  %v3903_v51 = vpack.c.bf16 %v1312_v13, %v1305_v57  ;;  %v2127_v18 = vand.u32 4294901760, %v2126_v33  ;;  %v5936_v57 = vld [vmem:[#allocation28_spill] sm:$0xff] }
 0x21a   : > { %3896 = vmatprep.subr.bf16.mxu1 %v5881_v53  ;;  %v5939_v33 = vld [vmem:[#allocation32_spill] sm:$0xff] }
 0x21b   : > { %4044 = vmatpush3.bf16.msra.mxu0 %v5264_v40  ;;  %v2113_v40 = vand.u32 4294901760, %v2112_v5  ;;  %v5922_v5 = vpack.c.bf16 %v4987_v31, %v5077_v32 }
 0x21c   : > { %4046 = vmatprep.subr.bf16.mxu0 %v5322_v46 }
 0x21d   : > { %3898 = vmatpush3.bf16.msra.mxu1 %v5331_v54  ;;  %v4053_v56 = vpack.c.bf16 %v2113_v40, %v2106_v11  ;;  %v2120_v54 = vand.u32 4294901760, %v2119_v35  ;;  %v4085_v11 = vpack.c.bf16 %v5420_v12, %v5411_v17  ;;  %v4089_v35 = vpack.c.bf16 %v5434_v43, %v5429_v39  ;;  %v5926_v12 = vld [vmem:[#allocation17_spill] sm:$0xff]  ;;  %v5932_v43 = vld [vmem:[#allocation19_spill] sm:$0xff] }
 0x21e   : > { %3899 = vmatprep.subr.bf16.mxu1 %v5881_v53  ;;  %v5929_v17 = vand.u32 4294901760, %v5418_v60  ;;  %v5931_v39 = vld [vmem:[#allocation21_spill] sm:$0xff]  ;;  %v5938_v40 = vld [vmem:[#allocation31_spill] sm:$0xff] }
 0x21f   : > { %4048 = vmatpush3.bf16.msra.mxu0 %v5322_v46  ;;  %v2140_v46 = vsub.f32 %v5443_v9, %v2139_v16  ;;  %v4057_v37 = vpack.c.bf16 %v2127_v18, %v2120_v54  ;;  %v5921_v16 = vpack.c.bf16 %v4932_v14, %v4998_v41  ;;  %v5940_v54 = vand.u32 4294901760, %v4912_v55  ;;  %v5942_v18 = vld [vmem:[#allocation33_spill] sm:$0xff] }
 0x220   : > { %4050 = vmatprep.subr.bf16.mxu0 %v5336_v62  ;;  %v5944_v55 = vand.u32 4294901760, %v4998_v41  ;;  %v5951_v41 = vand.u32 4294901760, %v4987_v31  ;;  %v5958_v31 = vand.u32 4294901760, %v5090_v21  ;;  %v5965_v21 = vld [vmem:[#allocation26_spill] sm:$0xff] }
 0x221   : > { %3901 = vmatpush3.bf16.msra.mxu1 %v3900_v4  ;;  %v2141_v24 = vand.u32 4294901760, %v2140_v46  ;;  %v5937_v4 = vld [vmem:[#allocation30_spill] sm:$0xff]  ;;  %v5943_v46 = vand.u32 4294901760, %v5366_v26 }
 0x222   : > { %3902 = vmatprep.subr.bf16.mxu1 %v5881_v53 }
 0x223   : > { %4052 = vmatpush3.bf16.msra.mxu0 %v5336_v62  ;;  %v4061_v62 = vpack.c.bf16 %v2141_v24, %v2134_v50 }
 0x224   : > { %4054 = vmatprep.subr.bf16.mxu0 %v4053_v56 }
 0x225   : > { %3904 = vmatpush3.bf16.msra.mxu1 %v3903_v51  ;;  %v3954_v51 = vpack.c.bf16 %v5941_v0, %v5940_v54 }
 0x226   : > { %3905 = vmatprep.subr.bf16.mxu1 %v5881_v53 }
 0x227   : > { %4056 = vmatpush3.bf16.msra.mxu0 %v4053_v56 }
 0x228   : > { %4058 = vmatprep.subr.bf16.mxu0 %v4057_v37  ;;  %3361 = vmatmul.mubr.f32.vlgmr.msra.gmra.mrb[2].mxu1 %v5347_v34 }
 0x229   : > { %3907 = vmatpush3.bf16.msra.mxu1 %v5920_v3  ;;  %3395 = vmatprep.mubr.msk.f32.mxu1 %vm4381_vm7, %v5883_v6  ;;  %v3957_v3 = vpack.c.bf16 %v5945_v7, %v5944_v55  ;;  %v5967_v55 = vld [vmem:[#allocation22_spill] sm:$0xff] }
 0x22a   : > { %3908 = vmatprep.subr.bf16.mxu1 %v5881_v53  ;;  %v5968_v7 = vand.u32 4294901760, %v5967_v55 }
 0x22b   : > { %4060 = vmatpush3.bf16.msra.mxu0 %v4057_v37 }
 0x22c   : > { %4062 = vmatprep.subr.bf16.mxu0 %v4061_v62 }
 0x22d   : > { %3910 = vmatpush3.bf16.msra.mxu1 %v5921_v16  ;;  %v5948_v16 = vld [vmem:[#allocation10_spill] sm:$0xff] }
 0x22e   : > { %3911 = vmatprep.subr.bf16.mxu1 %v5881_v53 }
 0x22f   : > { %4064 = vmatpush3.bf16.msra.mxu0 %v4061_v62 }
 0x230   : > { %4066 = vmatprep.subr.bf16.mxu0 %v5062_v45 }
 0x231   : > { %3913 = vmatpush3.bf16.msra.mxu1 %v5922_v5  ;;  %v5949_v5 = vand.u32 4294901760, %v5948_v16 }
 0x232   : > { %3571 = vmatmul.mubr.f32.vlgmr.msra.gmra.mrb[2].mxu0 %v5409_v48  ;;  %3914 = vmatprep.subr.bf16.mxu1 %v5881_v53 }
 0x233   : > { %4068 = vmatpush3.bf16.msra.mxu0 %v5062_v45  ;;  %3605 = vmatprep.mubr.f32.mxu0 %v5418_v60  ;;  %v5925_v45 = vpack.c.bf16 %v5258_v22, %v5299_v20  ;;  %v5935_v60 = vld [vmem:[#allocation27_spill] sm:$0xff] }
 0x234   : > { %4070 = vmatprep.subr.bf16.mxu0 %v5165_v58 }
 0x235   : > { %3916 = vmatpush3.bf16.msra.mxu1 %v5923_v15 }
 0x236   : > { %3917 = vmatprep.subr.bf16.mxu1 %v5881_v53 }
 0x237   : > { %4072 = vmatpush3.bf16.msra.mxu0 %v5165_v58  ;;  %v3924_v58 = vpack.c.bf16 %v5485_v25, %v5472_v23  ;;  %v951_v23 = vstv %s2749_s4 }
 0x238   : > { %4074 = vmatprep.subr.bf16.mxu0 %v5228_v29 }
 0x239   : > { %3919 = vmatpush3.bf16.msra.mxu1 %v5924_v47  ;;  %v5950_v47 = vand.u32 4294901760, %v5077_v32  ;;  %v5957_v32 = vand.u32 4294901760, %v5179_v59  ;;  %v5966_v59 = vand.u32 4294901760, %v5965_v21 }
 0x23a   : > { %3920 = vmatprep.subr.bf16.mxu1 %v5881_v53 }
 0x23b   : > { %4076 = vmatpush3.bf16.msra.mxu0 %v5228_v29  ;;  %v3927_v29 = vpack.c.bf16 %v5425_v30, %v5414_v36  ;;  %v4093_v36 = vpack.c.bf16 %v5443_v9, %v5450_v44  ;;  %v5930_v30 = vld [vmem:[#allocation15_spill] sm:$0xff]  ;;  %v5934_v44 = vld [vmem:[#allocation25_spill] sm:$0xff]  ;;  %v3960_v14 = vpack.c.bf16 %v5951_v41, %v5950_v47  ;;  %v3972_v41 = vpack.c.bf16 %v1296_v63, %v1289_v19 }
 0x23c   : > { %4078 = vmatprep.subr.bf16.mxu0 %v5290_v28  ;;  %v5933_v9 = vld [vmem:[#allocation23_spill] sm:$0xff]  ;;  %v953_v19 = vstv %s2750_s5 }
 0x23d   : > { %3922 = vmatpush3.bf16.msra.mxu1 %v5925_v45  ;;  %v5952_v45 = vand.u32 4294901760, %v5423_v10 }
 0x23e   : > { %3923 = vmatprep.subr.bf16.mxu1 %v5881_v53 }
 0x23f   : > { %4080 = vmatpush3.bf16.msra.mxu0 %v5290_v28  ;;  %v5927_v28 = vld [vmem:[#allocation12_spill] sm:$0xff] }
 0x240   : > { %4082 = vmatprep.subr.bf16.mxu0 %v5328_v2 }
 0x241   : > { %3925 = vmatpush3.bf16.msra.mxu1 %v3924_v58  ;;  %v5953_v58 = vld [vmem:[#allocation16_spill] sm:$0xff] }
 0x242   : > { %3926 = vmatprep.subr.bf16.mxu1 %v5881_v53 }
 0x243   : > { %4084 = vmatpush3.bf16.msra.mxu0 %v5328_v2  ;;  %v5928_v2 = vld [vmem:[#allocation18_spill] sm:$0xff] }
 0x244   : > { %4086 = vmatprep.subr.bf16.mxu0 %v4085_v11 }
 0x245   : > { %3928 = vmatpush3.bf16.msra.mxu1 %v3927_v29  ;;  %v5955_v29 = vld [vmem:[#allocation13_spill] sm:$0xff] }
 0x246   : > { %3929 = vmatprep.subr.bf16.mxu1 %v5881_v53 }
 0x247   : > { %4088 = vmatpush3.bf16.msra.mxu0 %v4085_v11  ;;  %v5954_v11 = vand.u32 4294901760, %v5953_v58 }
 0x248   : > { %4090 = vmatprep.subr.bf16.mxu0 %v4089_v35  ;;  %3396 = vmatmul.mubr.f32.vlgmr.msra.gmra.mrb[2].mxu1 %v5366_v26  ;;  %v5946_v26 = vld [vmem:[#allocation11_spill] sm:$0xff] }
 0x249   : > { %3931 = vmatpush3.bf16.msra.mxu1 %v5121_v38  ;;  %3430 = vmatprep.mubr.msk.f32.mxu1 %vm4381_vm7, %v5883_v6  ;;  %v5947_v62 = vand.u32 4294901760, %v5946_v26  ;;  %v5969_v26 = vand.u32 4294901760, %v5299_v20 }
 0x24a   : > { %3932 = vmatprep.subr.bf16.mxu1 %v5881_v53 }
 0x24b   : > { %4092 = vmatpush3.bf16.msra.mxu0 %v4089_v35  ;;  %v4129_v15 = vpack.c.bf16 %v5949_v5, %v5947_v62  ;;  %v5956_v35 = vand.u32 4294901760, %v5955_v29  ;;  %v5973_v5 = vld [vmem:[#allocation24_spill] sm:$0xff] }
 0x24c   : > { %4094 = vmatprep.subr.bf16.mxu0 %v4093_v36 }
 0x24d   : > { %3934 = vmatpush3.bf16.msra.mxu1 %v5926_v12 }
 0x24e   : > { %3935 = vmatprep.subr.bf16.mxu1 %v5881_v53 }
 0x24f   : > { %4096 = vmatpush3.bf16.msra.mxu0 %v4093_v36  ;;  %v4133_v36 = vpack.c.bf16 %v5956_v35, %v5954_v11  ;;  %v965_v35 = vld [vmem:[%s5731_s7] sm:$0x1] }
 0x250   : > { %4098 = vmatprep.subr.bf16.mxu0 %v5927_v28 }
 0x251   : > { %3937 = vmatpush3.bf16.msra.mxu1 %v5928_v2 }
 0x252   : > { %3606 = vmatmul.mubr.f32.vlgmr.msra.gmra.mrb[2].mxu0 %v5423_v10  ;;  %3938 = vmatprep.subr.bf16.mxu1 %v5881_v53 }
 0x253   : > { %4100 = vmatpush3.bf16.msra.mxu0 %v5927_v28  ;;  %3640 = vmatprep.mubr.f32.mxu0 %v5929_v17  ;;  %v3963_v17 = vpack.c.bf16 %v5958_v31, %v5957_v32 }
 0x254   : > { %4102 = vmatprep.subr.bf16.mxu0 %v5930_v30 }
 0x255   : > { %3940 = vmatpush3.bf16.msra.mxu1 %v5931_v39 }
 0x256   : > { %3941 = vmatprep.subr.bf16.mxu1 %v5881_v53 }
 0x257   : > { %4104 = vmatpush3.bf16.msra.mxu0 %v5930_v30 }
 0x258   : > { %4106 = vmatprep.subr.bf16.mxu0 %v5932_v43 }
 0x259   : > { %3943 = vmatpush3.bf16.msra.mxu1 %v5933_v9 }
 0x25a   : > { %3944 = vmatprep.subr.bf16.mxu1 %v5881_v53 }
 0x25b   : > { %4108 = vmatpush3.bf16.msra.mxu0 %v5932_v43 }
 0x25c   : > { %4110 = vmatprep.subr.bf16.mxu0 %v5934_v44 }
 0x25d   : > { %3946 = vmatpush3.bf16.msra.mxu1 %v5935_v60 }
 0x25e   : > { %3947 = vmatprep.subr.bf16.mxu1 %v5881_v53 }
 0x25f   : > { %4112 = vmatpush3.bf16.msra.mxu0 %v5934_v44 }
 0x260   : > { %4114 = vmatprep.subr.bf16.mxu0 %v5936_v57 }
 0x261   : > { %3949 = vmatpush3.bf16.msra.mxu1 %v5937_v4 }
 0x262   : > { %3950 = vmatprep.subr.bf16.mxu1 %v5881_v53 }
 0x263   : > { %4116 = vmatpush3.bf16.msra.mxu0 %v5936_v57 }
 0x264   : > { %4118 = vmatprep.subr.bf16.mxu0 %v5938_v40 }
 0x265   : > { %3952 = vmatpush3.bf16.msra.mxu1 %v5939_v33 }
 0x266   : > { %v941_v13 = vpop.f32.mrb[0].mxu0  ;;  %3953 = vmatprep.subr.bf16.mxu1 %v5881_v53 }
 0x267   : > { %v3292_v56 = vpop.f32.mrb[1].mxu0  ;;  %4120 = vmatpush3.bf16.msra.mxu0 %v5938_v40 }
 0x268   : > { %4122 = vmatprep.subr.bf16.mxu0 %v5942_v18  ;;  %3431 = vmatmul.mubr.f32.vlgmr.msra.gmra.mrb[2].mxu1 %v5943_v46  ;;  %v5961_v56 = vld [vmem:[#allocation14_spill] sm:$0xff]  ;;  %v5963_v46 = vand.u32 4294901760, %v5240_v49  ;;  %v5970_v49 = vand.u32 4294901760, %v5258_v22 }
 0x269   : > { %3955 = vmatpush3.bf16.msra.mxu1 %v3954_v51  ;;  %3465 = vmatprep.mubr.msk.f32.mxu1 %vm4381_vm7, %v5883_v6  ;;  %v5962_v54 = vand.u32 4294901760, %v5961_v56  ;;  %v5975_v22 = vld [vmem:[#allocation34_spill] sm:$0xff] }
 0x26a   : > { %v646_v37 = vpop.f32.mrb[0].mxu1  ;;  %3956 = vmatprep.subr.bf16.mxu1 %v5881_v53  ;;  %v3969_v62 = vpack.c.bf16 %v5970_v49, %v5969_v26 }
 0x26b   : > { %v5618_v50 = vadd.f32 %v941_v13, %v646_v37  ;;  %v3187_v24 = vpop.f32.mrb[1].mxu1  ;;  %4124 = vmatpush3.bf16.msra.mxu0 %v5942_v18  ;;  %v5959_v13 = vld [vmem:[#allocation20_spill] sm:$0xff]  ;;  %v5964_v37 = vand.u32 4294901760, %v5171_v61  ;;  %v5971_v61 = vld [vmem:[#allocation29_spill] sm:$0xff] }
 0x26c   : > { %4126 = vmatprep.subr.bf16.mxu0 %v5448_v52  ;;  %v5960_v10 = vand.u32 4294901760, %v5959_v13  ;;  %v5972_v16 = vand.u32 4294901760, %v5971_v61 }
 0x26d   : > { %4287 = vrcp.f32 %v5618_v50  ;;  %3958 = vmatpush3.bf16.msra.mxu1 %v3957_v3  ;;  %v3966_v24 = vpack.c.bf16 %v5964_v37, %v5963_v46  ;;  %v4141_v3 = vpack.c.bf16 %v5968_v7, %v5966_v59 }
 0x26e   : > { %3959 = vmatprep.subr.bf16.mxu1 %v5881_v53  ;;  %v4137_v0 = vpack.c.bf16 %v5962_v54, %v5960_v10 }
 0x26f   : > { %4128 = vmatpush3.bf16.msra.mxu0 %v5448_v52 }
 0x270   : > { %4130 = vmatprep.subr.bf16.mxu0 %v4129_v15 }
 0x271   : > { %3961 = vmatpush3.bf16.msra.mxu1 %v3960_v14  ;;  %v5976_v14 = vld [vmem:[#allocation9_spill] sm:$0xff] }
 0x272   : > { %3641 = vmatmul.mubr.f32.vlgmr.msra.gmra.mrb[2].mxu0 %v5952_v45  ;;  %3962 = vmatprep.subr.bf16.mxu1 %v5881_v53  ;;  %v5977_v45 = vld [vmem:[#allocation8_spill] sm:$0xff] }
 0x273   : > { %4132 = vmatpush3.bf16.msra.mxu0 %v4129_v15  ;;  %3675 = vmatprep.mubr.f32.mxu0 %v5401_v27  ;;  %v5974_v15 = vand.u32 4294901760, %v5973_v5  ;;  %v961_v58 = vsub.s32 %v5977_v45, %v5976_v14  ;;  %v2644_v54 = vadd.s32 4294967288, %v5977_v45 }
 0x274   : > { %4134 = vmatprep.subr.bf16.mxu0 %v4133_v36 }
 0x275   : > { %3964 = vmatpush3.bf16.msra.mxu1 %v3963_v17  ;;  %v4145_v47 = vpack.c.bf16 %v5974_v15, %v5972_v16 }
 0x276   : > { %3965 = vmatprep.subr.bf16.mxu1 %v5881_v53 }
 0x277   : > { %v4288_v51 = vpop.eup %4287  ;;  %4136 = vmatpush3.bf16.msra.mxu0 %v4133_v36 }
 0x278   : > { %947 = vrot.lane.b32.xlu1 %v4288_v51, %s4382_s3  ;;  %4138 = vmatprep.subr.bf16.mxu0 %v4137_v0  ;;  %v2647_v51 = vsub.s32 %v2644_v54, %v5976_v14 }
 0x279   : > { %3967 = vmatpush3.bf16.msra.mxu1 %v3966_v24 }
 0x27a   : > { %3968 = vmatprep.subr.bf16.mxu1 %v5881_v53 }
 0x27b   : > { %4140 = vmatpush3.bf16.msra.mxu0 %v4137_v0 }
 0x27c   : > { %4142 = vmatprep.subr.bf16.mxu0 %v4141_v3 }
 0x27d   : > { %3970 = vmatpush3.bf16.msra.mxu1 %v3969_v62 }
 0x27e   : > { %3971 = vmatprep.subr.bf16.mxu1 %v5881_v53 }
 0x27f   : > { %4144 = vmatpush3.bf16.msra.mxu0 %v4141_v3 }
 0x280   : > { %4146 = vmatprep.subr.bf16.mxu0 %v4145_v47 }
 0x281   : > { %3973 = vmatpush3.bf16.msra.mxu1 %v3972_v41 }
 0x282   : > { %3974 = vmatprep.subr.bf16.mxu1 %v5881_v53 }
 0x283   : > { %4148 = vmatpush3.bf16.msra.mxu0 %v4145_v47 }
 0x284   : > { %4150 = vmatprep.subr.bf16.mxu0 %v5975_v22 }
 0x285   : > { %3976 = vmatpush3.bf16.msra.mxu1 %v5475_v1  ;;  %v4383_v1 = vmov 0  }
 0x286   : > { %3977 = vmatprep.subr.bf16.mxu1 %v5881_v53  ;;  %4277 = vset.pattern.permute.xlu1 %v4383_v1 }
 0x287   : > { %4152 = vmatpush3.bf16.msra.mxu0 %v5975_v22  ;;  %4278 = vset.pattern.permute.xlu0 %v4383_v1 }
 0x288   : > { %4154 = vmatprep.subr.bf16.mxu0 %v5477_v42  ;;  %3466 = vmatmul.mubr.f32.vlgmr.msra.gmra.mrb[2].mxu1 %v5347_v34 }
 0x289   : > { %3979 = vmatpush3.bf16.msra.mxu1 %v5121_v38  ;;  %3500 = vmatprep.mubr.msk.f32.mxu1 %vm4381_vm7, %v5883_v6 }
 0x28a   : > { %3980 = vmatprep.subr.bf16.mxu1 %v5881_v53 }
 0x28b   : > { %4156 = vmatpush3.bf16.msra.mxu0 %v5477_v42 }
 0x28c   : > { %4158 = vmatprep.subr.bf16.mxu0 %v5480_v8 }
 0x28d   : > { %3982 = vmatpush3.bf16.msra.mxu1 %v5926_v12  ;;  %v1758_v12 = vstv %s2758_s8 }
 0x28e   : > { %3983 = vmatprep.subr.bf16.mxu1 %v5881_v53 }
 0x28f   : > { %4160 = vmatpush3.bf16.msra.mxu0 %v5480_v8 }
 0x290   : > { %4162 = vmatprep.subr.bf16.mxu0 %v5927_v28 }
 0x291   : > { %3985 = vmatpush3.bf16.msra.mxu1 %v5928_v2 }
 0x292   : > { %3676 = vmatmul.mubr.f32.vlgmr.msra.gmra.mrb[2].mxu0 %v5409_v48  ;;  %3986 = vmatprep.subr.bf16.mxu1 %v5881_v53 }
 0x293   : > { %4164 = vmatpush3.bf16.msra.mxu0 %v5927_v28  ;;  %3710 = vmatprep.mubr.f32.mxu0 %v5401_v27 }
 0x294   : > { %4166 = vmatprep.subr.bf16.mxu0 %v5930_v30 }
 0x295   : > { %3988 = vmatpush3.bf16.msra.mxu1 %v5931_v39 }
 0x296   : > { %3989 = vmatprep.subr.bf16.mxu1 %v5881_v53 }
 0x297   : > { %4168 = vmatpush3.bf16.msra.mxu0 %v5930_v30  ;;  %v1760_v30 = vstv %s2759_s14 }
 0x298   : > { %4170 = vmatprep.subr.bf16.mxu0 %v5932_v43 }
 0x299   : > { %3991 = vmatpush3.bf16.msra.mxu1 %v5933_v9 }
 0x29a   : > { %3992 = vmatprep.subr.bf16.mxu1 %v5881_v53 }
 0x29b   : > { %4172 = vmatpush3.bf16.msra.mxu0 %v5932_v43 }
 0x29c   : > { %4174 = vmatprep.subr.bf16.mxu0 %v5934_v44 }
 0x29d   : > { %3994 = vmatpush3.bf16.msra.mxu1 %v5935_v60 }
 0x29e   : > { %3995 = vmatprep.subr.bf16.mxu1 %v5881_v53 }
 0x29f   : > { %4176 = vmatpush3.bf16.msra.mxu0 %v5934_v44  ;;  %v2626_v44 = vstv %s2766_s16 }
 0x2a0   : > { %4178 = vmatprep.subr.bf16.mxu0 %v5936_v57 }
 0x2a1   : > { %3997 = vmatpush3.bf16.msra.mxu1 %v5937_v4 }
 0x2a2   : > { %3998 = vmatprep.subr.bf16.mxu1 %v5881_v53 }
 0x2a3   : > { %4180 = vmatpush3.bf16.msra.mxu0 %v5936_v57 }
 0x2a4   : > { %4182 = vmatprep.subr.bf16.mxu0 %v5938_v40 }
 0x2a5   : > { %4000 = vmatpush3.bf16.msra.mxu1 %v5939_v33 }
 0x2a7   : > { %4184 = vmatpush3.bf16.msra.mxu0 %v5938_v40  ;;  %v2629_v40 = vstv %s2767_s17 }
 0x2a8   : > { %4186 = vmatprep.subr.bf16.mxu0 %v5942_v18  ;;  %3501 = vmatmul.mubr.f32.vlgmr.msra.gmra.mrb[2].mxu1 %v5347_v34 }
 0x2ab   : > { %4188 = vmatpush3.bf16.msra.mxu0 %v5942_v18 }
 0x2ac   : > { %4190 = vmatprep.subr.bf16.mxu0 %v5448_v52 }
 0x2af   : > { %4192 = vmatpush3.bf16.msra.mxu0 %v5448_v52 }
 0x2b2   : > { %3711 = vmatmul.mubr.f32.vlgmr.msra.gmra.mrb[2].mxu0 %v5409_v48 }
 0x2ea   : > { %v948_v8 = vpop.permute.xlu1 %947 }
 0x2eb   : > { %v950_v48 = vmul.f32 %v5618_v50, %v948_v8 }
 0x2ed   : > { %v952_v25 = vmul.f32 %v951_v23, %v950_v48 }
 0x2ef   : > { %v954_v63 = vadd.f32 %v953_v19, %v952_v25 }
 0x37b   : > { %v1748_v53 = vpop.f32.mrb[2].mxu1 }
 0x37c   : > { %4289 = vrcp.f32 %v1748_v53  ;;  %v3502_v38 = vpop.f32.mrb[3].mxu1 }
 0x385   : > { %v3712_v27 = vpop.f32.mrb[2].mxu0 }
 0x386   : > { %v4290_v20 = vpop.eup %4289  ;;  %4291 = vrcp.f32 %v3712_v27  ;;  %v2604_v34 = vpop.f32.mrb[3].mxu0 }
 0x387   : > { %4293 = vrcp.f32 %v2604_v34  ;;  %1754 = vrot.lane.b32.xlu0 %v4290_v20, %s4382_s3 }
 0x390   : > { %v4292_v52 = vpop.eup %4291 }
 0x391   : > { %v4294_v42 = vpop.eup %4293  ;;  %2620 = vrot.lane.b32.xlu0 %v4292_v52, %s4382_s3 }
 0x392   : > { %2618 = vrot.lane.b32.xlu1 %v4294_v42, %s4382_s3 }
 0x396   : > { %957 = vperm.xlu1 %4277, %v954_v63  }
 0x3f9   : > { %v1755_v28 = vpop.permute.xlu0 %1754 }
 0x3fa   : > { %v1757_v2 = vmul.f32 %v1755_v28, %v1748_v53 }
 0x3fc   : > { %v1759_v39 = vmul.f32 %v1758_v12, %v1757_v2 }
 0x3fe   : > { %v1761_v43 = vadd.f32 %v1760_v30, %v1759_v39 }
 0x400   : > { %1764 = vperm.xlu0 %4278, %v1761_v43  }
 0x403   : > { %v2621_v9 = vpop.permute.xlu0 %2620 }
 0x404   : > { %v2619_v60 = vpop.permute.xlu1 %2618  ;;  %v2625_v57 = vmul.f32 %v3712_v27, %v2621_v9 }
 0x405   : > { %v2624_v4 = vmul.f32 %v2619_v60, %v2604_v34 }
 0x406   : > { %v2628_v33 = vmul.f32 %v2626_v44, %v2625_v57 }
 0x407   : > { %v2627_v6 = vmul.f32 %v2626_v44, %v2624_v4 }
 0x408   : > { %v2631_v50 = vadd.f32 %v2629_v40, %v2628_v33 }
 0x409   : > { %v2630_v18 = vadd.f32 %v2629_v40, %v2627_v6 }
 0x40b   : > { %2635 = vperm.xlu1 %4277, %v2630_v18  }
 0x40f   : > { %2638 = vperm.xlu1 %4277, %v2631_v50  }
 0x415   : > { %v958_v11 = vpop.permute.xlu1 %957 }
 0x416   : > { %v962_v29 = vrot.slane %v958_v11, %v961_v58 }
 0x418   : > { %v964_v36 = vsel %vm176_vm0, %v962_v29, 0.0 }
 0x419   : > { %v966_v32 = vadd.f32 %v965_v35, %v964_v36 }
 0x41b   : > { %968 = vst.msk [vmem:[%s5731_s7] sm:$0x1] %vm967_vm10, %v966_v32 }
 0x422   : > { %v1772_v10 = vld [vmem:[%s5731_s7] sm:$0x1] }
 0x47f   : > { %v1765_v31 = vpop.permute.xlu0 %1764 }
 0x480   : > { %v1769_v17 = vrot.slane %v1765_v31, %v961_v58 }
 0x482   : > { %v1771_v13 = vsel %vm990_vm2, %v1769_v17, 0.0 }
 0x483   : > { %v1773_v56 = vadd.f32 %v1772_v10, %v1771_v13 }
 0x485   : > { %1774 = vst.msk [vmem:[%s5731_s7] sm:$0x1] %vm967_vm10, %v1773_v56 }
 0x48a   : > { %v2636_v0 = vpop.permute.xlu1 %2635 }
 0x48b   : > { %v2643_v37 = vrot.slane %v2636_v0, %v961_v58 }
 0x48c   : > { %v2653_v55 = vld [vmem:[%s5731_s7] sm:$0x1] }
 0x48e   : > { %v2639_v46 = vpop.permute.xlu1 %2638 }
 0x48f   : > { %v2648_v24 = vrot.slane %v2639_v46, %v2647_v51 }
 0x491   : > { %v2650_v21 = vsel %vm2649_vm11, %v2648_v24, %v2643_v37 }
 0x492   : > { %v2652_v59 = vsel %vm1796_vm3, %v2650_v21, 0.0 }
 0x493   : > { %v2654_v7 = vadd.f32 %v2653_v55, %v2652_v59 }
 0x495   : > { %2656 = vst.msk [vmem:[%s5731_s7] sm:$0x1] %vm2655_vm12, %v2654_v7 }
 0x496   : > { %4323 = shalt.err (!%p4320_p2)
}
 0x497   : > { %s4324_s30 = scalar_lea.hbm %s5755_s25, 16  ;;  %s4328_s5 = scalar_lea.hbm %s5802_s2, 32 }
 0x498   : > { %p4325_p3 = scmp.ne.s32.totalorder %s5755_s25, %s4324_s30  ;;  %p4329_p8 = scmp.lt.u32.totalorder %s5755_s25, %s5802_s2 }
 0x499   : > { %p4330_p11 = scmp.lt.u32.totalorder %s4328_s5, %s4324_s30  ;;  %p4332_p10 = scmp.lt.u32.totalorder %s4324_s30, %s5755_s25 }
 0x49a   : > { %p4326_p4 = pnand %p4325_p3, %p4438_p5 }
 0x49b   : > { %p4331_p9 = por %p4330_p11, %p4329_p8 }
 0x49c   : > { %p4327_p7 = pneg %p4326_p4 }
 0x49d   : > { %p4333_p12 = por %p4332_p10, %p4331_p9 }
 0x49f   : > { %p4334_p13 = pnand %p4333_p12, %p4327_p7 }
 0x4a1   : > { %4337 = shalt.err (!%p4334_p13)
}
 0x4a2   : > { %4226 = dma.vmem_to_hbm [thread:$0]  (%p4438_p5), %s5757_s22, 16, %s5755_s25, %s2658_s13  }
 0x4a3 PF: > { %p4238_p0 = scmp.ge.s32.totalorder %s4376_s12, 2  ;;  %s2682_s8 = sand.u32 1, %s4364_s9  }
 0x4a4   : > { %s2683_s14 = scalar_lea.sflag [#allocation3], %s2682_s8 }
 0x4a5   : > { %p4233_p1 = pnand %p4238_p0, %p4442_p6 }
 0x4a7   : > { %4359 = dma.done.wait (!%p4233_p1), %s2683_s14, 16  }
 0x4a8   : > { %4361 = vsyncadd (!%p4233_p1), %s2683_s14, 4294967280  ;;  %p13_p2 = scmp.ge.s32.totalorder %s4425_s15, 4   ;;  %s5978_s9 = smov %s4368_s10 }
 0x4a9   : > { %s5979_s10 = smov %s4372_s11  ;;  %s5980_s11 = smov %s4436_s18 }
 0x4aa   : > { %s5981_s12 = smov %s4425_s15  ;;  %15 = sbr.rel (!%p13_p2) target bundleno = 4 (0x4), region = 68 }
 0x4b1   :  { %2687 = vsyncpa [#allocation3], 1 }
 0x4b2   :  { %2689 = vsyncpa [#allocation3 + $0x1], 1 }
 0x4b3   :  { %2690 = vsyncpa [#allocation4], 1 }
 0x4b4   :  { %2692 = vsyncpa [#allocation4 + $0x1], 1 }

</bundles_post_ra>
